<compile_context>
chip_gen: v7x
topology: tpu7x:2x2x1
jax: 0.10.0
libtpu: 0.0.40
codegen_flags: <defaults>
</compile_context>

<pallas_src>
import functools

import jax
import jax.numpy as jnp
from jax.experimental import pallas as pl
from jax.experimental.pallas import tpu as pltpu

LRELU_SLOPE = 0.1
BN_EPS = 1e-5


# ----------------------- fused small-tensor fast path -----------------------

def _fused_kernel(gamma_ref, beta_ref, w_ref, bias_ref, x_ref, o_ref, *, count):
    # Whole (N, C, S) activation resident in VMEM: exact batch statistics,
    # then BN + LeakyReLU + 1x1x1 conv + bias, all in one kernel.
    n_batch, n_ch, _ = x_ref.shape
    acc1 = jnp.zeros((n_ch, 1), jnp.float32)
    acc2 = jnp.zeros((n_ch, 1), jnp.float32)
    for n in range(n_batch):                       # small static batch loop
        xn = x_ref[n].astype(jnp.float32)          # (C, S)
        acc1 = acc1 + jnp.sum(xn, axis=1, keepdims=True)
        acc2 = acc2 + jnp.sum(xn * xn, axis=1, keepdims=True)
    inv_n = 1.0 / count
    mean = acc1 * inv_n                                          # (C, 1)
    var = jnp.maximum(acc2 * inv_n - mean * mean, 0.0)
    scale = gamma_ref[...] * jax.lax.rsqrt(var + BN_EPS)         # (C, 1)
    shift = beta_ref[...] - mean * scale
    w = w_ref[...]                                               # (Cout, C)
    b = bias_ref[...]                                            # (Cout, 1)
    for n in range(n_batch):
        a = x_ref[n].astype(jnp.float32) * scale + shift         # BN affine
        a = jnp.maximum(a, LRELU_SLOPE * a)                      # LeakyReLU(0.1)
        o_ref[n] = (jnp.dot(w, a, preferred_element_type=jnp.float32)
                    + b).astype(o_ref.dtype)


# ----------------------------- tiled two-pass path -----------------------------

def _stats_kernel(x_ref, sum_ref, sumsq_ref, *, S, tS):
    # x_ref: (1, C, tS) tile; sum/sumsq: (1, C, 1) accumulators resident across
    # the spatial-tile grid axis (marked "arbitrary").
    s = pl.program_id(1)

    @pl.when(s == 0)
    def _():
        sum_ref[...] = jnp.zeros_like(sum_ref)
        sumsq_ref[...] = jnp.zeros_like(sumsq_ref)

    x = x_ref[0].astype(jnp.float32)                   # (C, tS)
    if S % tS != 0:
        # Ragged last tile: exclude out-of-bounds (undefined) lanes from sums.
        col = s * tS + jax.lax.broadcasted_iota(jnp.int32, x.shape, 1)
        x = jnp.where(col < S, x, 0.0)
    sum_ref[0] += jnp.sum(x, axis=1, keepdims=True)
    sumsq_ref[0] += jnp.sum(x * x, axis=1, keepdims=True)


def _bn_lrelu_conv1_kernel(scale_ref, shift_ref, w_ref, bias_ref, x_ref, o_ref):
    # scale/shift: (C, 1) precomputed BN affine.  x_ref: (1, C, tS).
    # o_ref: (1, Cout, tS) lane-dense; out-of-bounds columns of a ragged last
    # tile are dropped by Pallas on store.
    x = x_ref[0].astype(jnp.float32)                   # (C, tS)
    a = x * scale_ref[...] + shift_ref[...]            # BN affine
    a = jnp.maximum(a, LRELU_SLOPE * a)                # LeakyReLU(0.1)
    o_ref[0] = (jnp.dot(w_ref[...], a, preferred_element_type=jnp.float32)
                + bias_ref[...]).astype(o_ref.dtype)


# ----------------------------- wrapper -----------------------------

def _pick_tile(S, C, Cout, in_itemsize, max_tile=8192):
    # Spatial tile: multiple of 128, bounded by a ~6 MiB per-step VMEM budget
    # (covers double-buffered x/out blocks plus in-kernel f32 temporaries).
    s_pad = ((S + 127) // 128) * 128
    per_col = 2 * (C * in_itemsize + Cout * 4) + 2 * C * 4
    budget = 6 * 1024 * 1024
    t = max(128, min(budget // per_col, max_tile, s_pad))
    t -= t % 128
    return int(t)


def one_conv_forward(x_ncdhw, params, *, allow_fast_path=True, max_tile=8192):
    N, C, D, H, W = x_ncdhw.shape
    S = D * H * W
    x3 = x_ncdhw.reshape(N, C, S)        # contiguous reshape, no data movement
    out_dtype = x_ncdhw.dtype
    count = float(N * S)                 # BatchNorm3d reduces over (N, D, H, W)

    Cout = params['w'].shape[0]
    gamma = params['gamma'].reshape(C, 1).astype(jnp.float32)
    beta = params['beta'].reshape(C, 1).astype(jnp.float32)
    w = params['w'].reshape(Cout, C).astype(jnp.float32)
    bias = params['b'].reshape(Cout, 1).astype(jnp.float32)

    # ---- small-tensor fast path: single fused call, whole tensor in VMEM ----
    raw_bytes = N * S * (C * x3.dtype.itemsize
                         + Cout * jnp.dtype(out_dtype).itemsize)
    if allow_fast_path and raw_bytes <= (4 << 20):
        out3 = pl.pallas_call(
            functools.partial(_fused_kernel, count=count),
            out_shape=jax.ShapeDtypeStruct((N, Cout, S), out_dtype),
        )(gamma, beta, w, bias, x3)
        return out3.reshape(N, Cout, D, H, W)

    # ---- tiled two-pass path ----
    tS = _pick_tile(S, C, Cout, x3.dtype.itemsize, max_tile=max_tile)
    nS = pl.cdiv(S, tS)

    # pass 1: per-batch channel sum / sum-of-squares, accumulated over tiles.
    sums, sumsqs = pl.pallas_call(
        functools.partial(_stats_kernel, S=S, tS=tS),
        out_shape=(jax.ShapeDtypeStruct((N, C, 1), jnp.float32),
                   jax.ShapeDtypeStruct((N, C, 1), jnp.float32)),
        grid=(N, nS),
        in_specs=[pl.BlockSpec((1, C, tS), lambda n, s: (n, 0, s))],
        out_specs=[pl.BlockSpec((1, C, 1), lambda n, s: (n, 0, 0)),
                   pl.BlockSpec((1, C, 1), lambda n, s: (n, 0, 0))],
        compiler_params=pltpu.CompilerParams(
            dimension_semantics=("parallel", "arbitrary"),
            vmem_limit_bytes=32 * 1024 * 1024),
    )(x3)

    # BN finalize on the tiny (N, C) stats in plain XLA -- hoisted out of the
    # pass-2 grid entirely.  NOTE: E[x^2]-E[x]^2 is mildly cancellation-prone;
    # fine at this tolerance for normalized inputs.
    mean = (jnp.sum(sums[:, :, 0], axis=0) / count).reshape(C, 1)
    ex2 = (jnp.sum(sumsqs[:, :, 0], axis=0) / count).reshape(C, 1)
    var = jnp.maximum(ex2 - mean * mean, 0.0)
    scale = gamma * jax.lax.rsqrt(var + BN_EPS)          # (C, 1)
    shift = beta - mean * scale                          # (C, 1)

    # pass 2: fused normalize + LeakyReLU + 1x1x1 conv + bias.
    out3 = pl.pallas_call(
        _bn_lrelu_conv1_kernel,
        out_shape=jax.ShapeDtypeStruct((N, Cout, S), out_dtype),
        grid=(N, nS),
        in_specs=[
            pl.BlockSpec((C, 1), lambda n, s: (0, 0)),        # scale
            pl.BlockSpec((C, 1), lambda n, s: (0, 0)),        # shift
            pl.BlockSpec((Cout, C), lambda n, s: (0, 0)),     # conv weight
            pl.BlockSpec((Cout, 1), lambda n, s: (0, 0)),     # conv bias
            pl.BlockSpec((1, C, tS), lambda n, s: (n, 0, s)),  # activation
        ],
        out_specs=pl.BlockSpec((1, Cout, tS), lambda n, s: (n, 0, s)),
        compiler_params=pltpu.CompilerParams(
            dimension_semantics=("parallel", "parallel"),
            vmem_limit_bytes=32 * 1024 * 1024),
    )(scale, shift, w, bias, x3)

    return out3.reshape(N, Cout, D, H, W)


# ----------------------------- parameters -----------------------------

def init_params(in_ch, out_ch, key):
    ks = jax.random.split(key, 4)
    return {
        'gamma': 1.0 + 0.1 * jax.random.normal(ks[0], (in_ch,), jnp.float32),
        'beta': 0.05 * jax.random.normal(ks[1], (in_ch,), jnp.float32),
        # Conv3d(in_ch, out_ch, 1) weight, stored as (out_ch, in_ch)
        'w': 0.1 * jax.random.normal(ks[2], (out_ch, in_ch), jnp.float32),
        'b': 0.05 * jax.random.normal(ks[3], (out_ch,), jnp.float32),
    }


# ----------------------------- pure-JAX reference -----------------------------

def reference_forward(x_ncdhw, params):
    x = x_ncdhw.astype(jnp.float32)
    mean = jnp.mean(x, axis=(0, 2, 3, 4), keepdims=True)
    var = jnp.var(x, axis=(0, 2, 3, 4), keepdims=True)   # biased, training-mode BN
    g = params['gamma'].reshape(1, -1, 1, 1, 1)
    b = params['beta'].reshape(1, -1, 1, 1, 1)
    a = (x - mean) * jax.lax.rsqrt(var + BN_EPS) * g + b
    a = jnp.where(a >= 0, a, LRELU_SLOPE * a)
    y = jnp.einsum('ncdhw,oc->nodhw', a, params['w'])
    return y + params['b'].reshape(1, -1, 1, 1, 1)


# ----------------------------- main -----------------------------

if __name__ == "__main__":
    key = jax.random.PRNGKey(0)
    kx1, kp1, kx2, kp2 = jax.random.split(key, 4)

    # Test 1: small tensor -> single fused fast-path kernel.
    in_ch, out_ch = 32, 16
    N, D, H, W = 2, 8, 16, 16
    x = jax.random.normal(kx1, (N, in_ch, D, H, W), jnp.float32)
    params = init_params(in_ch, out_ch, kp1)
    out = jax.block_until_ready(one_conv_forward(x, params))
    ref = reference_forward(x, params)
    assert out.shape == (N, out_ch, D, H, W), out.shape
    err1 = float(jnp.max(jnp.abs(out - ref)))
    assert err1 < 1e-3, f"fast path max abs err too large: {err1}"

    # Test 2: tiled two-pass path with a ragged (non multiple-of-128) spatial
    # extent and multiple tiles, exercising cdiv tiling + in-kernel masking.
    in_ch2, out_ch2 = 16, 8
    N2, D2, H2, W2 = 2, 4, 9, 13            # S = 468
    x2 = jax.random.normal(kx2, (N2, in_ch2, D2, H2, W2), jnp.float32)
    params2 = init_params(in_ch2, out_ch2, kp2)
    out2 = jax.block_until_ready(
        one_conv_forward(x2, params2, allow_fast_path=False, max_tile=256))
    ref2 = reference_forward(x2, params2)
    assert out2.shape == (N2, out_ch2, D2, H2, W2), out2.shape
    err2 = float(jnp.max(jnp.abs(out2 - ref2)))
    assert err2 < 1e-3, f"tiled path max abs err too large: {err2}"

    print("KERNEL_OK")
</pallas_src>

<mosaic_0001>
module attributes {stable_mosaic.version = 11 : i64} {
  func.func @_fused_kernel(%arg0: memref<32x1xf32, #tpu.memory_space<vmem>>, %arg1: memref<32x1xf32, #tpu.memory_space<vmem>>, %arg2: memref<16x32xf32, #tpu.memory_space<vmem>>, %arg3: memref<16x1xf32, #tpu.memory_space<vmem>>, %arg4: memref<2x32x2048xf32, #tpu.memory_space<vmem>>, %arg5: memref<2x16x2048xf32, #tpu.memory_space<vmem>>) attributes {dimension_semantics = [], scalar_prefetch = 0 : i64, scratch_operands = 0 : i64, tpu.core_type = #tpu.core_type<tc>} {
    %cst = arith.constant 0.000000e+00 : f32
    %0 = vector.broadcast %cst : f32 to vector<32x1xf32>
    %cst_0 = arith.constant 0.000000e+00 : f32
    %1 = vector.broadcast %cst_0 : f32 to vector<32x1xf32>
    %c0 = arith.constant 0 : index
    %c0_1 = arith.constant 0 : index
    %c0_2 = arith.constant 0 : index
    %2 = vector.load %arg4[%c0, %c0_1, %c0_2] : memref<2x32x2048xf32, #tpu.memory_space<vmem>>, vector<1x32x2048xf32>
    %3 = vector.shape_cast %2 : vector<1x32x2048xf32> to vector<32x2048xf32>
    %cst_3 = arith.constant dense<0.000000e+00> : vector<32xf32>
    %4 = vector.multi_reduction <add>, %3, %cst_3 [1] : vector<32x2048xf32> to vector<32xf32>
    %5 = vector.shape_cast %4 : vector<32xf32> to vector<32x1xf32>
    %6 = arith.addf %0, %5 : vector<32x1xf32>
    %7 = arith.mulf %3, %3 : vector<32x2048xf32>
    %cst_4 = arith.constant dense<0.000000e+00> : vector<32xf32>
    %8 = vector.multi_reduction <add>, %7, %cst_4 [1] : vector<32x2048xf32> to vector<32xf32>
    %9 = vector.shape_cast %8 : vector<32xf32> to vector<32x1xf32>
    %10 = arith.addf %1, %9 : vector<32x1xf32>
    %c1 = arith.constant 1 : index
    %c0_5 = arith.constant 0 : index
    %c0_6 = arith.constant 0 : index
    %11 = vector.load %arg4[%c1, %c0_5, %c0_6] : memref<2x32x2048xf32, #tpu.memory_space<vmem>>, vector<1x32x2048xf32>
    %12 = vector.shape_cast %11 : vector<1x32x2048xf32> to vector<32x2048xf32>
    %cst_7 = arith.constant dense<0.000000e+00> : vector<32xf32>
    %13 = vector.multi_reduction <add>, %12, %cst_7 [1] : vector<32x2048xf32> to vector<32xf32>
    %14 = vector.shape_cast %13 : vector<32xf32> to vector<32x1xf32>
    %15 = arith.addf %6, %14 : vector<32x1xf32>
    %16 = arith.mulf %12, %12 : vector<32x2048xf32>
    %cst_8 = arith.constant dense<0.000000e+00> : vector<32xf32>
    %17 = vector.multi_reduction <add>, %16, %cst_8 [1] : vector<32x2048xf32> to vector<32xf32>
    %18 = vector.shape_cast %17 : vector<32xf32> to vector<32x1xf32>
    %19 = arith.addf %10, %18 : vector<32x1xf32>
    %cst_9 = arith.constant 2.44140625E-4 : f32
    %20 = vector.broadcast %cst_9 : f32 to vector<32x1xf32>
    %21 = arith.mulf %15, %20 : vector<32x1xf32>
    %cst_10 = arith.constant 2.44140625E-4 : f32
    %22 = vector.broadcast %cst_10 : f32 to vector<32x1xf32>
    %23 = arith.mulf %19, %22 : vector<32x1xf32>
    %24 = arith.mulf %21, %21 : vector<32x1xf32>
    %25 = arith.subf %23, %24 : vector<32x1xf32>
    %cst_11 = arith.constant 0.000000e+00 : f32
    %26 = vector.broadcast %cst_11 : f32 to vector<32x1xf32>
    %27 = arith.maximumf %25, %26 : vector<32x1xf32>
    %c0_12 = arith.constant 0 : index
    %c0_13 = arith.constant 0 : index
    %28 = vector.load %arg0[%c0_12, %c0_13] : memref<32x1xf32, #tpu.memory_space<vmem>>, vector<32x1xf32>
    %cst_14 = arith.constant 9.99999974E-6 : f32
    %29 = vector.broadcast %cst_14 : f32 to vector<32x1xf32>
    %30 = arith.addf %27, %29 : vector<32x1xf32>
    %31 = math.rsqrt %30 : vector<32x1xf32>
    %32 = arith.mulf %28, %31 : vector<32x1xf32>
    %c0_15 = arith.constant 0 : index
    %c0_16 = arith.constant 0 : index
    %33 = vector.load %arg1[%c0_15, %c0_16] : memref<32x1xf32, #tpu.memory_space<vmem>>, vector<32x1xf32>
    %34 = arith.mulf %21, %32 : vector<32x1xf32>
    %35 = arith.subf %33, %34 : vector<32x1xf32>
    %c0_17 = arith.constant 0 : index
    %c0_18 = arith.constant 0 : index
    %36 = vector.load %arg2[%c0_17, %c0_18] : memref<16x32xf32, #tpu.memory_space<vmem>>, vector<16x32xf32>
    %c0_19 = arith.constant 0 : index
    %c0_20 = arith.constant 0 : index
    %37 = vector.load %arg3[%c0_19, %c0_20] : memref<16x1xf32, #tpu.memory_space<vmem>>, vector<16x1xf32>
    %c0_21 = arith.constant 0 : index
    %c0_22 = arith.constant 0 : index
    %c0_23 = arith.constant 0 : index
    %38 = vector.load %arg4[%c0_21, %c0_22, %c0_23] : memref<2x32x2048xf32, #tpu.memory_space<vmem>>, vector<1x32x2048xf32>
    %39 = vector.shape_cast %38 : vector<1x32x2048xf32> to vector<32x2048xf32>
    %40 = vector.broadcast %32 : vector<32x1xf32> to vector<32x2048xf32>
    %41 = arith.mulf %39, %40 : vector<32x2048xf32>
    %42 = vector.broadcast %35 : vector<32x1xf32> to vector<32x2048xf32>
    %43 = arith.addf %41, %42 : vector<32x2048xf32>
    %cst_24 = arith.constant 1.000000e-01 : f32
    %44 = vector.broadcast %cst_24 : f32 to vector<32x2048xf32>
    %45 = arith.mulf %44, %43 : vector<32x2048xf32>
    %46 = arith.maximumf %43, %45 : vector<32x2048xf32>
    %cst_25 = arith.constant dense<0.000000e+00> : vector<16x2048xf32>
    %47 = tpu.matmul %36, %46, %cst_25 {dimension_numbers = #tpu.dot_dimension_numbers<[1], [0], [0], [1], [0, 0, 1, 1], [], []>} : vector<16x32xf32>, vector<32x2048xf32>, vector<16x2048xf32> -> vector<16x2048xf32>
    %48 = vector.broadcast %37 : vector<16x1xf32> to vector<16x2048xf32>
    %49 = arith.addf %47, %48 : vector<16x2048xf32>
    %c0_26 = arith.constant 0 : index
    %c0_27 = arith.constant 0 : index
    %c0_28 = arith.constant 0 : index
    %50 = vector.load %arg5[%c0_26, %c0_27, %c0_28] : memref<2x16x2048xf32, #tpu.memory_space<vmem>>, vector<1x16x2048xf32>
    %51 = vector.shape_cast %50 : vector<1x16x2048xf32> to vector<16x2048xf32>
    %52 = vector.shape_cast %49 : vector<16x2048xf32> to vector<1x16x2048xf32>
    tpu.vector_store %arg5[%c0_26, %c0_27, %c0_28], %52 {strides = array<i32>} : memref<2x16x2048xf32, #tpu.memory_space<vmem>>, vector<1x16x2048xf32>,
    %c1_29 = arith.constant 1 : index
    %c0_30 = arith.constant 0 : index
    %c0_31 = arith.constant 0 : index
    %53 = vector.load %arg4[%c1_29, %c0_30, %c0_31] : memref<2x32x2048xf32, #tpu.memory_space<vmem>>, vector<1x32x2048xf32>
    %54 = vector.shape_cast %53 : vector<1x32x2048xf32> to vector<32x2048xf32>
    %55 = vector.broadcast %32 : vector<32x1xf32> to vector<32x2048xf32>
    %56 = arith.mulf %54, %55 : vector<32x2048xf32>
    %57 = vector.broadcast %35 : vector<32x1xf32> to vector<32x2048xf32>
    %58 = arith.addf %56, %57 : vector<32x2048xf32>
    %cst_32 = arith.constant 1.000000e-01 : f32
    %59 = vector.broadcast %cst_32 : f32 to vector<32x2048xf32>
    %60 = arith.mulf %59, %58 : vector<32x2048xf32>
    %61 = arith.maximumf %58, %60 : vector<32x2048xf32>
    %cst_33 = arith.constant dense<0.000000e+00> : vector<16x2048xf32>
    %62 = tpu.matmul %36, %61, %cst_33 {dimension_numbers = #tpu.dot_dimension_numbers<[1], [0], [0], [1], [0, 0, 1, 1], [], []>} : vector<16x32xf32>, vector<32x2048xf32>, vector<16x2048xf32> -> vector<16x2048xf32>
    %63 = vector.broadcast %37 : vector<16x1xf32> to vector<16x2048xf32>
    %64 = arith.addf %62, %63 : vector<16x2048xf32>
    %c1_34 = arith.constant 1 : index
    %c0_35 = arith.constant 0 : index
    %c0_36 = arith.constant 0 : index
    %65 = vector.load %arg5[%c1_34, %c0_35, %c0_36] : memref<2x16x2048xf32, #tpu.memory_space<vmem>>, vector<1x16x2048xf32>
    %66 = vector.shape_cast %65 : vector<1x16x2048xf32> to vector<16x2048xf32>
    %67 = vector.shape_cast %64 : vector<16x2048xf32> to vector<1x16x2048xf32>
    tpu.vector_store %arg5[%c1_34, %c0_35, %c0_36], %67 {strides = array<i32>} : memref<2x16x2048xf32, #tpu.memory_space<vmem>>, vector<1x16x2048xf32>,
    return
  }
}

</mosaic_0001>

<bundles_post_ra>
// kernel: tpu_custom_call.1
= control target key start
LH: loop header
LB: loop body
LE: loop exit
PB: predicated region body
PF: predicated region fallthrough
CT: control target
= control target key end

     0   :  { %10 = vsyncpa [#allocation3], 0  ;;  %s4294_s0 = inlined_call_operand.vmem [shape: f32[32,1], index: 0, kind: input, shape index: {}]   ;;  %s4295_s1 = inlined_call_operand.vmem [shape: f32[32,1], index: 1, kind: input, shape index: {}]   ;;  %s4296_s2 = inlined_call_operand.vmem [shape: f32[16,32], index: 2, kind: input, shape index: {}]   ;;  %s4297_s3 = inlined_call_operand.vmem [shape: f32[16,1], index: 3, kind: input, shape index: {}]   ;;  %s4298_s4 = inlined_call_operand.hbm [shape: f32[2,32,2048], index: 4, kind: input, shape index: {}]   ;;  %s4299_s5 = inlined_call_operand.hbm [shape: f32[2,16,2048], index: 5, kind: output, shape index: {}]  }
   0x1   :  { %11 = vsyncpa [#allocation4], 0  ;;  %s2843_s18 = smov [#allocation2]   ;;  %s2795_s22 = scalar_lea.hbm %s4298_s4, 16384 }
   0x2   :  { %s25_s19 = sshll.u32 %s2843_s18, 4  ;;  %p2796_p0 = scmp.ne.s32.totalorder %s4298_s4, %s2795_s22  ;;  %s26_s19 = int_to_ptr.vmem [resolvable:$true] %s25_s19 }
   0x3   :  { %p2799_p1 = scmp.lt.u32.totalorder %s2795_s22, %s4298_s4 }
   0x5   :  { %p2801_p2 = pnand %p2799_p1, %p2796_p0 }
   0x7   :  { %2804 = shalt.err (!%p2801_p2)
}
   0x8   :  { %s2805_s27 = scalar_lea.vmem %s26_s19, 16384  ;;  %p2810_p4 = scmp.lt.s32.totalorder %s26_s19, %s26_s19 }
   0x9   :  { %p2806_p3 = scmp.ne.s32.totalorder %s26_s19, %s2805_s27  ;;  %p2811_p5 = scmp.lt.s32.totalorder %s2805_s27, %s2805_s27 }
   0xb   :  { %p2812_p6 = por %p2811_p5, %p2810_p4 }
   0xd   :  { %p2813_p7 = pnand %p2812_p6, %p2806_p3 }
   0xf   :  { %2816 = shalt.err (!%p2813_p7)
}
  0x10   :  { %s2844_s28 = smov 2048   ;;  %s2845_s29 = smov 128  }
  0x11   :  { %31 = dma.hbm_to_vmem [thread:$0]  %s4298_s4, 16384, %s26_s19, [#allocation3], %s2844_s28, %s2844_s28, %s2845_s29  }
  0x12   :  { %2839 = dma.done.wait [#allocation3], 16384  }
  0x13   :  { %2840 = vsyncadd [#allocation3], 4294950912  ;;  %v308_v0 = vld [vmem:[#allocation2 + $0x200] sm:$0xff]  ;;  %v309_v1 = vld [vmem:[#allocation2 + $0x208] sm:$0xff]  ;;  %vm938_vm0 = vcmask 261120  }
  0x14   :  { %v310_v2 = vld [vmem:[#allocation2 + $0x210] sm:$0xff]  ;;  %v372_v3 = vadd.f32 %v309_v1, %v308_v0  ;;  %v311_v4 = vld [vmem:[#allocation2 + $0x218] sm:$0xff]  ;;  %v312_v6 = vld [vmem:[#allocation2 + $0x220] sm:$0xff]  ;;  %v444_v16 = vmul.f32 %v308_v0, %v308_v0  ;;  %v445_v17 = vmul.f32 %v309_v1, %v309_v1 }
  0x15   :  { %v35_v8 = vld [vmem:[#allocation2] sm:$0xff]  ;;  %v36_v9 = vld [vmem:[#allocation2 + $0x8] sm:$0xff]  ;;  %v37_v11 = vld [vmem:[#allocation2 + $0x10] sm:$0xff]  ;;  %v2894_v22 = vmul.f32 %v310_v2, %v310_v2  ;;  %v2896_v23 = vmul.f32 %v311_v4, %v311_v4  ;;  %v2898_v24 = vmul.f32 %v312_v6, %v312_v6 }
  0x16   :  { %v373_v5 = vadd.f32 %v372_v3, %v310_v2  ;;  %v313_v10 = vld [vmem:[#allocation2 + $0x228] sm:$0xff]  ;;  %v99_v12 = vadd.f32 %v36_v9, %v35_v8  ;;  %v38_v14 = vld [vmem:[#allocation2 + $0x18] sm:$0xff]  ;;  %v314_v15 = vld [vmem:[#allocation2 + $0x230] sm:$0xff]  ;;  %v171_v38 = vmul.f32 %v35_v8, %v35_v8  ;;  %v172_v39 = vmul.f32 %v36_v9, %v36_v9 }
  0x17   :  { %v315_v19 = vld [vmem:[#allocation2 + $0x238] sm:$0xff]  ;;  %v316_v20 = vld [vmem:[#allocation2 + $0x240] sm:$0xff]  ;;  %v317_v26 = vld [vmem:[#allocation2 + $0x248] sm:$0xff]  ;;  %v2900_v28 = vmul.f32 %v313_v10, %v313_v10  ;;  %v2902_v29 = vmul.f32 %v314_v15, %v314_v15  ;;  %v2927_v51 = vadd.f32 %v445_v17, %v444_v16  ;;  %v173_v55 = vmul.f32 %v37_v11, %v37_v11 }
  0x18   :  { %v374_v7 = vadd.f32 %v373_v5, %v311_v4  ;;  %v100_v18 = vadd.f32 %v99_v12, %v37_v11  ;;  %v39_v25 = vld [vmem:[#allocation2 + $0x20] sm:$0xff]  ;;  %v318_v27 = vld [vmem:[#allocation2 + $0x250] sm:$0xff]  ;;  %v2904_v30 = vmul.f32 %v315_v19, %v315_v19  ;;  %v2906_v34 = vmul.f32 %v316_v20, %v316_v20  ;;  %v40_v35 = vld [vmem:[#allocation2 + $0x28] sm:$0xff] }
  0x19   :  { %v324_v32 = vld [vmem:[#allocation2 + $0x280] sm:$0xff]  ;;  %v2908_v36 = vld [vmem:[#allocation2 + $0x288] sm:$0xff]  ;;  %v2910_v37 = vld [vmem:[#allocation2 + $0x290] sm:$0xff]  ;;  %v2914_v42 = vmul.f32 %v317_v26, %v317_v26  ;;  %v2916_v43 = vmul.f32 %v318_v27, %v318_v27  ;;  %v174_v56 = vmul.f32 %v38_v14, %v38_v14  ;;  %v2932_v61 = vmul.f32 %v39_v25, %v39_v25 }
  0x1a   :  { %v375_v13 = vadd.f32 %v374_v7, %v312_v6  ;;  %v101_v31 = vadd.f32 %v100_v18, %v38_v14  ;;  %v319_v40 = vld [vmem:[#allocation2 + $0x258] sm:$0xff]  ;;  %v2912_v41 = vld [vmem:[#allocation2 + $0x260] sm:$0xff]  ;;  %v389_v45 = vadd.f32 %v2908_v36, %v324_v32  ;;  %v41_v49 = vld [vmem:[#allocation2 + $0x30] sm:$0xff]  ;;  %v2934_v62 = vmul.f32 %v40_v35, %v40_v35 }
  0x1b   :  { %4356 = vst [vmem:[#allocation8_spill] sm:$0xff] %v2914_v42  ;;  %4357 = vst [vmem:[#allocation9_spill] sm:$0xff] %v2916_v43  ;;  %v2919_v47 = vmul.f32 %v319_v40, %v319_v40  ;;  %v2923_v48 = vmul.f32 %v2912_v41, %v2912_v41  ;;  %v2925_v50 = vld [vmem:[#allocation2 + $0x298] sm:$0xff]  ;;  %v43_v58 = vld [vmem:[#allocation2 + $0x40] sm:$0xff]  ;;  %v235_v63 = vadd.f32 %v172_v39, %v171_v38 }
  0x1c   :  { %v376_v21 = vadd.f32 %v375_v13, %v313_v10  ;;  %v102_v44 = vadd.f32 %v101_v31, %v39_v25  ;;  %v42_v52 = vld [vmem:[#allocation2 + $0x38] sm:$0xff]  ;;  %v390_v54 = vadd.f32 %v389_v45, %v2910_v37  ;;  %v44_v59 = vld [vmem:[#allocation2 + $0x48] sm:$0xff]  ;;  %v2930_v60 = vld [vmem:[#allocation2 + $0x2a0] sm:$0xff]  ;;  %v2937_v5 = vmul.f32 %v41_v49, %v41_v49 }
  0x1d   :  { %4358 = vst [vmem:[#allocation10_spill] sm:$0xff] %v2919_v47  ;;  %4359 = vst [vmem:[#allocation11_spill] sm:$0xff] %v2923_v48  ;;  %v51_v2 = vld [vmem:[#allocation2 + $0x80] sm:$0xff]  ;;  %v52_v3 = vld [vmem:[#allocation2 + $0x88] sm:$0xff]  ;;  %v2939_v6 = vmul.f32 %v42_v52, %v42_v52  ;;  %v2943_v12 = vmul.f32 %v43_v58, %v43_v58  ;;  %v2945_v13 = vmul.f32 %v44_v59, %v44_v59 }
  0x1e   :  { %v377_v33 = vadd.f32 %v376_v21, %v314_v15  ;;  %v103_v53 = vadd.f32 %v102_v44, %v40_v35  ;;  %v391_v1 = vadd.f32 %v390_v54, %v2925_v50  ;;  %v53_v4 = vld [vmem:[#allocation2 + $0x90] sm:$0xff]  ;;  %v46_v9 = vld [vmem:[#allocation2 + $0x58] sm:$0xff]  ;;  %v2941_v10 = vld [vmem:[#allocation2 + $0x2a8] sm:$0xff]  ;;  %v116_v11 = vadd.f32 %v52_v3, %v51_v2 }
  0x1f   :  { %v45_v8 = vld [vmem:[#allocation2 + $0x50] sm:$0xff]  ;;  %v2947_v14 = vld [vmem:[#allocation2 + $0x60] sm:$0xff]  ;;  %v54_v17 = vld [vmem:[#allocation2 + $0x98] sm:$0xff]  ;;  %v2967_v45 = vmul.f32 %v324_v32, %v324_v32  ;;  %v187_v54 = vmul.f32 %v51_v2, %v51_v2 }
  0x20   :  { %v378_v46 = vadd.f32 %v377_v33, %v315_v19  ;;  %v104_v0 = vadd.f32 %v103_v53, %v41_v49  ;;  %v392_v16 = vadd.f32 %v391_v1, %v2930_v60  ;;  %v2950_v18 = vmul.f32 %v45_v8, %v45_v8  ;;  %v2954_v21 = vld [vmem:[#allocation2 + $0x68] sm:$0xff]  ;;  %v2956_v25 = vld [vmem:[#allocation2 + $0x2b0] sm:$0xff]  ;;  %v55_v39 = vld [vmem:[#allocation2 + $0xa0] sm:$0xff] }
  0x21   :  { %v2952_v19 = vmul.f32 %v46_v9, %v46_v9  ;;  %v2960_v31 = vmul.f32 %v2947_v14, %v2947_v14  ;;  %v236_v33 = vadd.f32 %v235_v63, %v173_v55  ;;  %v2965_v44 = vmul.f32 %v2954_v21, %v2954_v21  ;;  %v2973_v53 = vld [vmem:[#allocation2 + $0x188] sm:$0xff] }
  0x22   :  { %v379_v57 = vadd.f32 %v378_v46, %v316_v20  ;;  %v105_v15 = vadd.f32 %v104_v0, %v42_v52  ;;  %v393_v38 = vadd.f32 %v392_v16, %v2941_v10  ;;  %v2969_v46 = vld [vmem:[#allocation2 + $0x2b8] sm:$0xff]  ;;  %v2971_v52 = vld [vmem:[#allocation2 + $0x180] sm:$0xff]  ;;  %v2977_v55 = vmul.f32 %v2908_v36, %v2908_v36  ;;  %v56_v32 = vld [vmem:[#allocation2 + $0xa8] sm:$0xff] }
  0x23   :  { %v2982_v0 = vld [vmem:[#allocation2 + $0x190] sm:$0xff]  ;;  %v188_v1 = vmul.f32 %v52_v3, %v52_v3  ;;  %v237_v36 = vadd.f32 %v236_v33, %v174_v56  ;;  %v3006_v33 = vld [vmem:[#allocation2 + $0x1a0] sm:$0xff]  ;;  %v191_v48 = vmul.f32 %v55_v39, %v55_v39  ;;  %v3018_v42 = vld [vmem:[#allocation2 + $0x1a8] sm:$0xff] }
  0x24   :  { %v380_v7 = vadd.f32 %v379_v57, %v317_v26  ;;  %v117_v26 = vadd.f32 %v116_v11, %v53_v4  ;;  %v106_v35 = vadd.f32 %v105_v15, %v43_v58  ;;  %v2979_v57 = vld [vmem:[#allocation2 + $0x268] sm:$0xff]  ;;  %v394_v63 = vadd.f32 %v393_v38, %v2956_v25  ;;  %4360 = vst [vmem:[#allocation12_spill] sm:$0xff] %v2982_v0  ;;  %v2987_v11 = vld [vmem:[#allocation2 + $0x2c0] sm:$0xff]  ;;  %v2989_v15 = vld [vmem:[#allocation2 + $0x198] sm:$0xff] }
  0x25   :  { %4361 = vst [vmem:[#allocation13_spill] sm:$0xff] %v2989_v15  ;;  %v2995_v16 = vld [vmem:[#allocation2 + $0x270] sm:$0xff]  ;;  %v3001_v38 = vld [vmem:[#allocation2 + $0x278] sm:$0xff]  ;;  %4365 = vst [vmem:[#allocation17_spill] sm:$0xff] %v3006_v33  ;;  %v252_v43 = vadd.f32 %v188_v1, %v187_v54 }
  0x26   :  { %v381_v20 = vadd.f32 %v380_v7, %v318_v27  ;;  %v118_v49 = vadd.f32 %v117_v26, %v54_v17  ;;  %v107_v58 = vadd.f32 %v106_v35, %v44_v59  ;;  %v2993_v59 = vmul.f32 %v2910_v37, %v2910_v37  ;;  %4362 = vst [vmem:[#allocation14_spill] sm:$0xff] %v2995_v16  ;;  %v2998_v35 = vld [vmem:[#allocation2 + $0xb0] sm:$0xff]  ;;  %v3029_v54 = vld [vmem:[#allocation2 + $0xc0] sm:$0xff] }
  0x27   :  { %v395_v26 = vadd.f32 %v394_v63, %v2969_v46  ;;  %4363 = vst [vmem:[#allocation15_spill] sm:$0xff] %v2998_v35  ;;  %4364 = vst [vmem:[#allocation16_spill] sm:$0xff] %v3001_v38  ;;  %v190_v37 = vmul.f32 %v54_v17, %v54_v17  ;;  %v3011_v63 = vld [vmem:[#allocation2 + $0xb8] sm:$0xff]  ;;  %v3020_v17 = vld [vmem:[#allocation2 + $0x108] sm:$0xff] }
  0x28   :  { %v382_v27 = vadd.f32 %v381_v20, %v319_v40  ;;  %v150_v40 = vadd.f32 %v2973_v53, %v2971_v52  ;;  %v119_v2 = vadd.f32 %v118_v49, %v55_v39  ;;  %v108_v20 = vadd.f32 %v107_v58, %v45_v8  ;;  %v3004_v49 = vld [vmem:[#allocation2 + $0x2c8] sm:$0xff]  ;;  %v3008_v8 = vld [vmem:[#allocation2 + $0x2d0] sm:$0xff]  ;;  %4367 = vst [vmem:[#allocation19_spill] sm:$0xff] %v3011_v63 }
  0x29   :  { %4366 = vst [vmem:[#allocation18_spill] sm:$0xff] %v3008_v8  ;;  %v396_v58 = vadd.f32 %v395_v26, %v2987_v11  ;;  %4369 = vst [vmem:[#allocation21_spill] sm:$0xff] %v3018_v42  ;;  %v192_v39 = vmul.f32 %v56_v32, %v56_v32  ;;  %v3025_v26 = vld [vmem:[#allocation2 + $0x70] sm:$0xff] }
  0x2a   :  { %v383_v7 = vadd.f32 %v382_v27, %v2912_v41  ;;  %v151_v3 = vadd.f32 %v150_v40, %v2982_v0  ;;  %v189_v41 = vmul.f32 %v53_v4, %v53_v4  ;;  %v120_v56 = vadd.f32 %v119_v2, %v56_v32  ;;  %v3014_v40 = vld [vmem:[#allocation2 + $0x100] sm:$0xff]  ;;  %4370 = vst [vmem:[#allocation22_spill] sm:$0xff] %v3020_v17  ;;  %v3094_v0 = vld [vmem:[#allocation2 + $0x2f8] sm:$0xff] }
  0x2b   :  { %v109_v47 = vadd.f32 %v108_v20, %v46_v9  ;;  %4368 = vst [vmem:[#allocation20_spill] sm:$0xff] %v3014_v40  ;;  %v3022_v9 = vld [vmem:[#allocation2 + $0x110] sm:$0xff]  ;;  %v238_v20 = vadd.f32 %v237_v36, %v2932_v61  ;;  %4372 = vst [vmem:[#allocation24_spill] sm:$0xff] %v3025_v26  ;;  %v3040_v36 = vld [vmem:[#allocation2 + $0x118] sm:$0xff] }
  0x2c   :  { %v384_v27 = vadd.f32 %v383_v7, %v2979_v57  ;;  %v152_v4 = vadd.f32 %v151_v3, %v2989_v15  ;;  %v121_v2 = vadd.f32 %v120_v56, %v2998_v35  ;;  %4371 = vst [vmem:[#allocation23_spill] sm:$0xff] %v3022_v9  ;;  %v397_v15 = vadd.f32 %v396_v58, %v3004_v49  ;;  %v3038_v61 = vld [vmem:[#allocation2 + $0x1b0] sm:$0xff]  ;;  %v3043_v58 = vld [vmem:[#allocation2 + $0x78] sm:$0xff] }
  0x2d   :  { %v110_v3 = vadd.f32 %v109_v47, %v2947_v14  ;;  %4373 = vst [vmem:[#allocation25_spill] sm:$0xff] %v3029_v54  ;;  %4375 = vst [vmem:[#allocation27_spill] sm:$0xff] %v3038_v61  ;;  %v253_v47 = vadd.f32 %v252_v43, %v189_v41  ;;  %v239_v14 = vadd.f32 %v238_v20, %v2934_v62  ;;  %v3056_v62 = vld [vmem:[#allocation2 + $0x1b8] sm:$0xff]  ;;  %v3058_v41 = vld [vmem:[#allocation2 + $0x120] sm:$0xff] }
  0x2e   :  { %v385_v7 = vadd.f32 %v384_v27, %v2995_v16  ;;  %v153_v1 = vadd.f32 %v152_v4, %v3006_v33  ;;  %v133_v27 = vadd.f32 %v3020_v17, %v3014_v40  ;;  %v3035_v16 = vld [vmem:[#allocation2 + $0x2d8] sm:$0xff]  ;;  %v122_v32 = vadd.f32 %v121_v2, %v3011_v63  ;;  %4376 = vst [vmem:[#allocation28_spill] sm:$0xff] %v3040_v36  ;;  %v3046_v33 = vld [vmem:[#allocation2 + $0x2e0] sm:$0xff]  ;;  %v3053_v40 = vld [vmem:[#allocation2 + $0xd0] sm:$0xff] }
  0x2f   :  { %4374 = vst [vmem:[#allocation26_spill] sm:$0xff] %v3035_v16  ;;  %v111_v4 = vadd.f32 %v110_v3, %v2954_v21  ;;  %4377 = vst [vmem:[#allocation29_spill] sm:$0xff] %v3046_v33  ;;  %v398_v17 = vadd.f32 %v397_v15, %v3008_v8  ;;  %v193_v21 = vmul.f32 %v2998_v35, %v2998_v35  ;;  %v3073_v8 = vld [vmem:[#allocation2 + $0x2e8] sm:$0xff] }
  0x30   :  { %v386_v56 = vadd.f32 %v385_v7, %v3001_v38  ;;  %v3049_v7 = vld [vmem:[#allocation2 + $0xc8] sm:$0xff]  ;;  %v154_v38 = vadd.f32 %v153_v1, %v3018_v42  ;;  %v134_v2 = vadd.f32 %v133_v27, %v3022_v9  ;;  %4379 = vst [vmem:[#allocation31_spill] sm:$0xff] %v3053_v40  ;;  %v123_v43 = vadd.f32 %v122_v32, %v3029_v54  ;;  %v3067_v9 = vld [vmem:[#allocation2 + $0x380] sm:$0xff]  ;;  %v3071_v42 = vld [vmem:[#allocation2 + $0x390] sm:$0xff] }
  0x31   :  { %4378 = vst [vmem:[#allocation30_spill] sm:$0xff] %v3049_v7  ;;  %4380 = vst [vmem:[#allocation32_spill] sm:$0xff] %v3056_v62  ;;  %v254_v20 = vadd.f32 %v253_v47, %v190_v37  ;;  %v240_v15 = vadd.f32 %v239_v14, %v2937_v5  ;;  %v112_v3 = vadd.f32 %v111_v4, %v3025_v26  ;;  %v3069_v32 = vld [vmem:[#allocation2 + $0x388] sm:$0xff]  ;;  %v3076_v47 = vld [vmem:[#allocation2 + $0x1c0] sm:$0xff] }
  0x32   :  { %387 = vadd.xlane.f32.xlu1 %v386_v56  ;;  %4381 = vst [vmem:[#allocation33_spill] sm:$0xff] %v3058_v41  ;;  %v399_v1 = vadd.f32 %v398_v17, %v3035_v16  ;;  %v155_v27 = vadd.f32 %v154_v38, %v3038_v61  ;;  %v135_v56 = vadd.f32 %v134_v2, %v3040_v36  ;;  %4382 = vst [vmem:[#allocation34_spill] sm:$0xff] %v3067_v9  ;;  %v3078_v5 = vld [vmem:[#allocation2 + $0x128] sm:$0xff]  ;;  %v3085_v2 = vld [vmem:[#allocation2 + $0x2f0] sm:$0xff] }
  0x33   :  { %4383 = vst [vmem:[#allocation35_spill] sm:$0xff] %v3069_v32  ;;  %4384 = vst [vmem:[#allocation36_spill] sm:$0xff] %v3071_v42  ;;  %v124_v37 = vadd.f32 %v123_v43, %v3049_v7  ;;  %v423_v17 = vadd.f32 %v3069_v32, %v3067_v9  ;;  %v194_v38 = vmul.f32 %v3011_v63, %v3011_v63  ;;  %v3088_v36 = vld [vmem:[#allocation2 + $0xd8] sm:$0xff]  ;;  %v3097_v63 = vld [vmem:[#allocation2 + $0x1c8] sm:$0xff] }
  0x34   :  { %4385 = vst [vmem:[#allocation37_spill] sm:$0xff] %v3076_v47  ;;  %4386 = vst [vmem:[#allocation38_spill] sm:$0xff] %v3078_v5  ;;  %v255_v14 = vadd.f32 %v254_v20, %v191_v48  ;;  %v113_v4 = vadd.f32 %v112_v3, %v3043_v58  ;;  %v400_v35 = vadd.f32 %v399_v1, %v3046_v33  ;;  %v3092_v16 = vld [vmem:[#allocation2 + $0x398] sm:$0xff]  ;;  %v3099_v48 = vld [vmem:[#allocation2 + $0x130] sm:$0xff] }
  0x35   :  { %4387 = vst [vmem:[#allocation39_spill] sm:$0xff] %v3085_v2  ;;  %4388 = vst [vmem:[#allocation40_spill] sm:$0xff] %v3088_v36  ;;  %v156_v43 = vadd.f32 %v155_v27, %v3056_v62  ;;  %v136_v61 = vadd.f32 %v135_v56, %v3058_v41  ;;  %v125_v32 = vadd.f32 %v124_v37, %v3053_v40  ;;  %v3104_v9 = vld [vmem:[#allocation2 + $0xe0] sm:$0xff]  ;;  %v3106_v56 = vld [vmem:[#allocation2 + $0x1d0] sm:$0xff] }
  0x36   :  { %4389 = vst [vmem:[#allocation41_spill] sm:$0xff] %v3092_v16  ;;  %4390 = vst [vmem:[#allocation42_spill] sm:$0xff] %v3097_v63  ;;  %v424_v20 = vadd.f32 %v423_v17, %v3071_v42  ;;  %v256_v3 = vadd.f32 %v255_v14, %v192_v39  ;;  %v241_v1 = vadd.f32 %v240_v15, %v2939_v6  ;;  %114 = vadd.xlane.f32.xlu0 %v113_v4  ;;  %v3110_v62 = vld [vmem:[#allocation2 + $0x3a0] sm:$0xff]  ;;  %v3115_v17 = vld [vmem:[#allocation2 + $0x138] sm:$0xff] }
  0x37   :  { %4391 = vst [vmem:[#allocation43_spill] sm:$0xff] %v3099_v48  ;;  %v401_v27 = vadd.f32 %v400_v35, %v3073_v8  ;;  %4392 = vst [vmem:[#allocation44_spill] sm:$0xff] %v3104_v9  ;;  %v157_v41 = vadd.f32 %v156_v43, %v3076_v47  ;;  %v137_v37 = vadd.f32 %v136_v61, %v3078_v5  ;;  %v3118_v35 = vld [vmem:[#allocation2 + $0x300] sm:$0xff]  ;;  %v3120_v15 = vld [vmem:[#allocation2 + $0x308] sm:$0xff] }
  0x38   :  { %4393 = vst [vmem:[#allocation45_spill] sm:$0xff] %v3110_v62  ;;  %v195_v33 = vmul.f32 %v3029_v54, %v3029_v54  ;;  %v126_v39 = vadd.f32 %v125_v32, %v3088_v36  ;;  %v425_v6 = vadd.f32 %v424_v20, %v3092_v16  ;;  %4394 = vst [vmem:[#allocation46_spill] sm:$0xff] %v3118_v35  ;;  %v3125_v43 = vld [vmem:[#allocation2 + $0xe8] sm:$0xff]  ;;  %v3131_v5 = vld [vmem:[#allocation2 + $0x310] sm:$0xff] }
  0x39   :  { %4395 = vst [vmem:[#allocation47_spill] sm:$0xff] %v3120_v15  ;;  %v196_v14 = vmul.f32 %v3049_v7, %v3049_v7  ;;  %v257_v4 = vadd.f32 %v256_v3, %v193_v21  ;;  %v402_v61 = vadd.f32 %v401_v27, %v3085_v2  ;;  %4396 = vst [vmem:[#allocation48_spill] sm:$0xff] %v3125_v43  ;;  %v3129_v42 = vld [vmem:[#allocation2 + $0x3a8] sm:$0xff]  ;;  %v3136_v47 = vld [vmem:[#allocation2 + $0x1d8] sm:$0xff] }
  0x3a   :  { %v158_v54 = vadd.f32 %v157_v41, %v3097_v63  ;;  %v138_v32 = vadd.f32 %v137_v37, %v3099_v48  ;;  %4397 = vst [vmem:[#allocation49_spill] sm:$0xff] %v3129_v42  ;;  %4398 = vst [vmem:[#allocation50_spill] sm:$0xff] %v3131_v5  ;;  %v406_v20 = vadd.f32 %v3120_v15, %v3118_v35  ;;  %v3138_v21 = vld [vmem:[#allocation2 + $0x140] sm:$0xff]  ;;  %v3141_v27 = vld [vmem:[#allocation2 + $0x318] sm:$0xff] }
  0x3b   :  { %v127_v16 = vadd.f32 %v126_v39, %v3104_v9  ;;  %4399 = vst [vmem:[#allocation51_spill] sm:$0xff] %v3136_v47  ;;  %4400 = vst [vmem:[#allocation52_spill] sm:$0xff] %v3138_v21  ;;  %v426_v3 = vadd.f32 %v425_v6, %v3110_v62  ;;  %v258_v41 = vadd.f32 %v257_v4, %v194_v38  ;;  %v3145_v48 = vld [vmem:[#allocation2 + $0xf0] sm:$0xff]  ;;  %v3153_v6 = vld [vmem:[#allocation2 + $0x1e0] sm:$0xff] }
  0x3c   :  { %4401 = vst [vmem:[#allocation53_spill] sm:$0xff] %v3141_v27  ;;  %v242_v37 = vadd.f32 %v241_v1, %v2943_v12  ;;  %v403_v7 = vadd.f32 %v402_v61, %v3094_v0  ;;  %4402 = vst [vmem:[#allocation54_spill] sm:$0xff] %v3145_v48  ;;  %v159_v63 = vadd.f32 %v158_v54, %v3106_v56  ;;  %v3149_v39 = vld [vmem:[#allocation2 + $0x3b0] sm:$0xff]  ;;  %v3155_v62 = vld [vmem:[#allocation2 + $0x148] sm:$0xff] }
  0x3d   :  { %v139_v15 = vadd.f32 %v138_v32, %v3115_v17  ;;  %v407_v35 = vadd.f32 %v406_v20, %v3131_v5  ;;  %v128_v2 = vadd.f32 %v127_v16, %v3125_v43  ;;  %v427_v12 = vadd.f32 %v426_v3, %v3129_v42  ;;  %v3158_v38 = vld [vmem:[#allocation2 + $0x320] sm:$0xff]  ;;  %v3162_v4 = vld [vmem:[#allocation2 + $0xf8] sm:$0xff]  ;;  %v3172_v42 = vld [vmem:[#allocation2 + $0x1e8] sm:$0xff] }
  0x3e   :  { %4403 = vst [vmem:[#allocation55_spill] sm:$0xff] %v3158_v38  ;;  %v197_v1 = vmul.f32 %v3053_v40, %v3053_v40  ;;  %v259_v54 = vadd.f32 %v258_v41, %v195_v33  ;;  %404 = vadd.xlane.f32.xlu1 %v403_v7  ;;  %4404 = vst [vmem:[#allocation56_spill] sm:$0xff] %v3162_v4  ;;  %v160_v61 = vadd.f32 %v159_v63, %v3136_v47  ;;  %v3166_v16 = vld [vmem:[#allocation2 + $0x3b8] sm:$0xff]  ;;  %v3174_v40 = vld [vmem:[#allocation2 + $0x150] sm:$0xff] }
  0x3f   :  { %v140_v32 = vadd.f32 %v139_v15, %v3138_v21  ;;  %4405 = vst [vmem:[#allocation57_spill] sm:$0xff] %v3166_v16  ;;  %v408_v20 = vadd.f32 %v407_v35, %v3141_v27  ;;  %v198_v3 = vmul.f32 %v3088_v36, %v3088_v36  ;;  %v129_v5 = vadd.f32 %v128_v2, %v3145_v48  ;;  %v3177_v7 = vld [vmem:[#allocation2 + $0x328] sm:$0xff]  ;;  %v3182_v27 = vld [vmem:[#allocation2 + $0x3c0] sm:$0xff]  ;;  %v3188_v47 = vld [vmem:[#allocation2 + $0x1f0] sm:$0xff] }
  0x40   :  { %v428_v33 = vadd.f32 %v427_v12, %v3149_v39  ;;  %4406 = vst [vmem:[#allocation58_spill] sm:$0xff] %v3177_v7  ;;  %v260_v63 = vadd.f32 %v259_v54, %v196_v14  ;;  %v243_v15 = vadd.f32 %v242_v37, %v2945_v13  ;;  %v161_v41 = vadd.f32 %v160_v61, %v3153_v6  ;;  %v3190_v12 = vld [vmem:[#allocation2 + $0x158] sm:$0xff]  ;;  %v3193_v13 = vld [vmem:[#allocation2 + $0x330] sm:$0xff] }
  0x41   :  { %v141_v35 = vadd.f32 %v140_v32, %v3155_v62  ;;  %v409_v36 = vadd.f32 %v408_v20, %v3158_v38  ;;  %v463_v2 = vmul.f32 %v2925_v50, %v2925_v50  ;;  %v130_v21 = vadd.f32 %v129_v5, %v3162_v4  ;;  %4407 = vst [vmem:[#allocation59_spill] sm:$0xff] %v3193_v13  ;;  %v3199_v20 = vld [vmem:[#allocation2 + $0x3c8] sm:$0xff]  ;;  %v3204_v38 = vld [vmem:[#allocation2 + $0x1f8] sm:$0xff] }
  0x42   :  { %v429_v14 = vadd.f32 %v428_v33, %v3166_v16  ;;  %v261_v37 = vadd.f32 %v260_v63, %v197_v1  ;;  %v464_v54 = vmul.f32 %v2930_v60, %v2930_v60  ;;  %v162_v61 = vadd.f32 %v161_v41, %v3172_v42  ;;  %v3206_v33 = vld [vmem:[#allocation2 + $0x160] sm:$0xff]  ;;  %v3209_v63 = vld [vmem:[#allocation2 + $0x338] sm:$0xff] }
  0x43   :  { %v142_v32 = vadd.f32 %v141_v35, %v3174_v40  ;;  %v410_v50 = vadd.f32 %v409_v36, %v3177_v7  ;;  %v199_v5 = vmul.f32 %v3104_v9, %v3104_v9  ;;  %131 = vadd.xlane.f32.xlu0 %v130_v21  ;;  %v244_v41 = vadd.f32 %v243_v15, %v2950_v18  ;;  %v3216_v9 = vld [vmem:[#allocation2 + $0x3d0] sm:$0xff] }
  0x44   :  { %v430_v1 = vadd.f32 %v429_v14, %v3182_v27  ;;  %v262_v60 = vadd.f32 %v261_v37, %v198_v3  ;;  %v525_v35 = vadd.f32 %v2977_v55, %v2967_v45  ;;  %v163_v36 = vadd.f32 %v162_v61, %v3188_v47  ;;  %v3221_v14 = vld [vmem:[#allocation2 + $0x168] sm:$0xff]  ;;  %v3224_v37 = vld [vmem:[#allocation2 + $0x340] sm:$0xff] }
  0x45   :  { %v143_v7 = vadd.f32 %v142_v32, %v3190_v12  ;;  %v411_v21 = vadd.f32 %v410_v50, %v3193_v13  ;;  %v509_v16 = vadd.f32 %v2927_v51, %v2894_v22  ;;  %v200_v18 = vmul.f32 %v3125_v43, %v3125_v43  ;;  %v3233_v32 = vld [vmem:[#allocation2 + $0x3d8] sm:$0xff]  ;;  %v3237_v50 = vld [vmem:[#allocation2 + $0x170] sm:$0xff]  ;;  %v3240_v43 = vld [vmem:[#allocation2 + $0x348] sm:$0xff] }
  0x46   :  { %v431_v3 = vadd.f32 %v430_v1, %v3199_v20  ;;  %v465_v45 = vmul.f32 %v2941_v10, %v2941_v10  ;;  %v526_v55 = vadd.f32 %v525_v35, %v2993_v59  ;;  %v164_v15 = vadd.f32 %v163_v36, %v3204_v38 }
  0x47   :  { %v144_v61 = vadd.f32 %v143_v7, %v3206_v33  ;;  %v412_v22 = vadd.f32 %v411_v21, %v3209_v63  ;;  %v510_v51 = vadd.f32 %v509_v16, %v2896_v23  ;;  %v263_v13 = vadd.f32 %v262_v60, %v199_v5  ;;  %v3244_v7 = vld [vmem:[#allocation2 + $0x3e0] sm:$0xff]  ;;  %v3250_v21 = vld [vmem:[#allocation2 + $0x178] sm:$0xff]  ;;  %v3253_v5 = vld [vmem:[#allocation2 + $0x350] sm:$0xff] }
  0x48   :  { %v432_v1 = vadd.f32 %v431_v3, %v3216_v9  ;;  %v245_v10 = vadd.f32 %v244_v41, %v2952_v19  ;;  %v527_v59 = vadd.f32 %v526_v55, %v463_v2  ;;  %165 = vadd.xlane.f32.xlu1 %v164_v15  ;;  %v185_v23 = vmul.f32 %v3025_v26, %v3025_v26  ;;  %v3260_v55 = vld [vmem:[#allocation2 + $0x3e8] sm:$0xff] }
  0x49   :  { %v145_v35 = vadd.f32 %v144_v61, %v3221_v14  ;;  %v413_v36 = vadd.f32 %v412_v22, %v3224_v37  ;;  %v511_v16 = vadd.f32 %v510_v51, %v2898_v24  ;;  %v466_v19 = vmul.f32 %v2956_v25, %v2956_v25  ;;  %v3267_v51 = vld [vmem:[#allocation2 + $0x358] sm:$0xff] }
  0x4a   :  { %v433_v3 = vadd.f32 %v432_v1, %v3233_v32  ;;  %v467_v2 = vmul.f32 %v2969_v46, %v2969_v46  ;;  %v528_v60 = vadd.f32 %v527_v59, %v464_v54  ;;  %v201_v24 = vmul.f32 %v3145_v48, %v3145_v48  ;;  %v3271_v59 = vld [vmem:[#allocation2 + $0x3f0] sm:$0xff] }
  0x4b   :  { %v146_v41 = vadd.f32 %v145_v35, %v3237_v50  ;;  %v414_v15 = vadd.f32 %v413_v36, %v3240_v43  ;;  %v512_v61 = vadd.f32 %v511_v16, %v2900_v28  ;;  %v264_v25 = vadd.f32 %v263_v13, %v200_v18  ;;  %v3278_v16 = vld [vmem:[#allocation2 + $0x360] sm:$0xff] }
  0x4c   :  { %v434_v22 = vadd.f32 %v433_v3, %v3244_v7  ;;  %v246_v1 = vadd.f32 %v245_v10, %v2960_v31  ;;  %v529_v46 = vadd.f32 %v528_v60, %v465_v45  ;;  %v468_v36 = vmul.f32 %v2987_v11, %v2987_v11  ;;  %v3284_v45 = vld [vmem:[#allocation2 + $0x3f8] sm:$0xff] }
  0x4d   :  { %v147_v54 = vadd.f32 %v146_v41, %v3250_v21  ;;  %v415_v35 = vadd.f32 %v414_v15, %v3253_v5  ;;  %v513_v48 = vadd.f32 %v512_v61, %v2902_v29  ;;  %v202_v13 = vmul.f32 %v3162_v4, %v3162_v4  ;;  %v3293_v41 = vld [vmem:[#allocation2 + $0x368] sm:$0xff] }
  0x4e   :  { %v435_v28 = vadd.f32 %v434_v22, %v3260_v55  ;;  %v469_v31 = vmul.f32 %v3004_v49, %v3004_v49  ;;  %v530_v18 = vadd.f32 %v529_v46, %v466_v19  ;;  %v219_v29 = vmul.f32 %v2971_v52, %v2971_v52  ;;  %v3303_v46 = vld [vmem:[#allocation2 + $0x370] sm:$0xff]  ;;  %v4415_v4 = vld [vmem:[#allocation29_spill] sm:$0xff] }
  0x4f   :  { %148 = vadd.xlane.f32.xlu0 %v147_v54  ;;  %v416_v10 = vadd.f32 %v415_v35, %v3267_v51  ;;  %v514_v11 = vadd.f32 %v513_v48, %v2904_v30  ;;  %v220_v3 = vmul.f32 %v2973_v53, %v2973_v53  ;;  %v265_v15 = vadd.f32 %v264_v25, %v201_v24  ;;  %v4408_v48 = vld [vmem:[#allocation12_spill] sm:$0xff]  ;;  %v4409_v25 = vld [vmem:[#allocation18_spill] sm:$0xff]  ;;  %v4411_v35 = vld [vmem:[#allocation13_spill] sm:$0xff] }
  0x50   :  { %v436_v60 = vadd.f32 %v435_v28, %v3271_v59  ;;  %v247_v49 = vadd.f32 %v246_v1, %v2965_v44  ;;  %v531_v19 = vadd.f32 %v530_v18, %v467_v2  ;;  %v457_v61 = vmul.f32 %v2979_v57, %v2979_v57  ;;  %v4410_v1 = vld [vmem:[#allocation8_spill] sm:$0xff]  ;;  %v3313_v18 = vld [vmem:[#allocation2 + $0x378] sm:$0xff] }
  0x51   :  { %v417_v22 = vadd.f32 %v416_v10, %v3278_v16  ;;  %v515_v30 = vadd.f32 %v514_v11, %v2906_v34  ;;  %v221_v52 = vmul.f32 %v4408_v48, %v4408_v48  ;;  %v186_v24 = vmul.f32 %v3043_v58, %v3043_v58 }
  0x52   :  { %v437_v53 = vadd.f32 %v436_v60, %v3284_v45  ;;  %v470_v44 = vmul.f32 %v4409_v25, %v4409_v25  ;;  %v532_v2 = vadd.f32 %v531_v19, %v468_v36  ;;  %v222_v34 = vmul.f32 %v4411_v35, %v4411_v35  ;;  %v4412_v60 = vld [vmem:[#allocation26_spill] sm:$0xff]  ;;  %v4413_v36 = vld [vmem:[#allocation9_spill] sm:$0xff] }
  0x53   :  { %v418_v57 = vadd.f32 %v417_v22, %v3293_v41  ;;  %v516_v54 = vadd.f32 %v515_v30, %v4410_v1  ;;  %v286_v28 = vadd.f32 %v220_v3, %v219_v29  ;;  %v266_v10 = vadd.f32 %v265_v15, %v202_v13  ;;  %v4414_v22 = vld [vmem:[#allocation17_spill] sm:$0xff] }
  0x54   :  { %438 = vadd.xlane.f32.xlu1 %v437_v53  ;;  %v248_v11 = vadd.f32 %v247_v49, %v185_v23  ;;  %v471_v48 = vmul.f32 %v4412_v60, %v4412_v60  ;;  %v533_v26 = vadd.f32 %v532_v2, %v469_v31  ;;  %v223_v30 = vmul.f32 %v4414_v22, %v4414_v22  ;;  %v4416_v53 = vld [vmem:[#allocation20_spill] sm:$0xff]  ;;  %v4417_v23 = vld [vmem:[#allocation22_spill] sm:$0xff] }
  0x55   :  { %v419_v25 = vadd.f32 %v418_v57, %v3303_v46  ;;  %v517_v19 = vadd.f32 %v516_v54, %v4413_v36  ;;  %v287_v1 = vadd.f32 %v286_v28, %v221_v52  ;;  %v472_v29 = vmul.f32 %v4415_v4, %v4415_v4  ;;  %v4418_v49 = vld [vmem:[#allocation10_spill] sm:$0xff]  ;;  %v4419_v57 = vld [vmem:[#allocation21_spill] sm:$0xff] }
  0x56   :  { %v534_v3 = vadd.f32 %v533_v26, %v470_v44  ;;  %v203_v13 = vmul.f32 %v4416_v53, %v4416_v53  ;;  %v204_v15 = vmul.f32 %v4417_v23, %v4417_v23  ;;  %v224_v54 = vmul.f32 %v4419_v57, %v4419_v57  ;;  %v4420_v60 = vld [vmem:[#allocation14_spill] sm:$0xff]  ;;  %v4421_v44 = vld [vmem:[#allocation23_spill] sm:$0xff] }
  0x57   :  { %v420_v31 = vadd.f32 %v419_v25, %v3313_v18  ;;  %v518_v2 = vadd.f32 %v517_v19, %v4418_v49  ;;  %v288_v35 = vadd.f32 %v287_v1, %v222_v34  ;;  %v458_v52 = vmul.f32 %v4420_v60, %v4420_v60  ;;  %v4422_v25 = vld [vmem:[#allocation11_spill] sm:$0xff] }
  0x58   :  { %267 = vadd.xlane.f32.xlu1 %v266_v10  ;;  %v473_v26 = vmul.f32 %v3073_v8, %v3073_v8  ;;  %v535_v4 = vadd.f32 %v534_v3, %v471_v48  ;;  %v205_v28 = vmul.f32 %v4421_v44, %v4421_v44  ;;  %v249_v36 = vadd.f32 %v248_v11, %v186_v24  ;;  %v4423_v19 = vld [vmem:[#allocation27_spill] sm:$0xff]  ;;  %v4425_v10 = vld [vmem:[#allocation28_spill] sm:$0xff] }
  0x59   :  { %421 = vadd.xlane.f32.xlu0 %v420_v31  ;;  %v519_v22 = vadd.f32 %v518_v2, %v4422_v25  ;;  %v225_v53 = vmul.f32 %v4423_v19, %v4423_v19  ;;  %v289_v23 = vadd.f32 %v288_v35, %v223_v30  ;;  %v4424_v34 = vld [vmem:[#allocation39_spill] sm:$0xff]  ;;  %v206_v57 = vmul.f32 %v4425_v10, %v4425_v10  ;;  %v4426_v48 = vld [vmem:[#allocation16_spill] sm:$0xff]  ;;  %v4428_v35 = vld [vmem:[#allocation33_spill] sm:$0xff] }
  0x5a   :  { %v474_v1 = vmul.f32 %v4424_v34, %v4424_v34  ;;  %v536_v49 = vadd.f32 %v535_v4, %v472_v29  ;;  %v269_v8 = vadd.f32 %v204_v15, %v203_v13  ;;  %v459_v3 = vmul.f32 %v4426_v48, %v4426_v48  ;;  %v4427_v31 = vld [vmem:[#allocation32_spill] sm:$0xff]  ;;  %v4429_v25 = vld [vmem:[#allocation37_spill] sm:$0xff]  ;;  %v4430_v19 = vld [vmem:[#allocation38_spill] sm:$0xff] }
  0x5b   :  { %v520_v60 = vadd.f32 %v519_v22, %v457_v61  ;;  %v226_v24 = vmul.f32 %v4427_v31, %v4427_v31  ;;  %v290_v11 = vadd.f32 %v289_v23, %v224_v54  ;;  %v475_v2 = vmul.f32 %v3094_v0, %v3094_v0  ;;  %v4431_v54 = vld [vmem:[#allocation34_spill] sm:$0xff]  ;;  %v4432_v0 = vld [vmem:[#allocation35_spill] sm:$0xff] }
  0x5c   :  { %v537_v30 = vadd.f32 %v536_v49, %v473_v26  ;;  %v207_v44 = vmul.f32 %v4428_v35, %v4428_v35  ;;  %v270_v29 = vadd.f32 %v269_v8, %v205_v28  ;;  %v227_v13 = vmul.f32 %v4429_v25, %v4429_v25  ;;  %v4433_v10 = vld [vmem:[#allocation42_spill] sm:$0xff]  ;;  %v4434_v8 = vld [vmem:[#allocation43_spill] sm:$0xff] }
  0x5d   :  { %250 = vadd.xlane.f32.xlu0 %v249_v36  ;;  %v521_v4 = vadd.f32 %v520_v60, %v458_v52  ;;  %v291_v15 = vadd.f32 %v290_v11, %v225_v53  ;;  %v208_v61 = vmul.f32 %v4430_v19, %v4430_v19  ;;  %v492_v23 = vmul.f32 %v4431_v54, %v4431_v54  ;;  %v4435_v60 = vld [vmem:[#allocation36_spill] sm:$0xff]  ;;  %v4437_v35 = vld [vmem:[#allocation51_spill] sm:$0xff]  ;;  %v4439_v19 = vld [vmem:[#allocation45_spill] sm:$0xff] }
  0x5e   :  { %v538_v22 = vadd.f32 %v537_v30, %v474_v1  ;;  %v271_v34 = vadd.f32 %v270_v29, %v206_v57  ;;  %v493_v26 = vmul.f32 %v4432_v0, %v4432_v0  ;;  %v228_v28 = vmul.f32 %v4433_v10, %v4433_v10  ;;  %v4436_v30 = vld [vmem:[#allocation41_spill] sm:$0xff] }
  0x5f   :  { %v522_v49 = vadd.f32 %v521_v4, %v459_v3  ;;  %v292_v52 = vadd.f32 %v291_v15, %v226_v24  ;;  %v209_v53 = vmul.f32 %v4434_v8, %v4434_v8  ;;  %v494_v1 = vmul.f32 %v4435_v60, %v4435_v60  ;;  %v4438_v4 = vld [vmem:[#allocation52_spill] sm:$0xff]  ;;  %v4442_v10 = vld [vmem:[#allocation49_spill] sm:$0xff] }
  0x60   :  { %v539_v36 = vadd.f32 %v538_v22, %v475_v2  ;;  %v272_v48 = vadd.f32 %v271_v34, %v207_v44  ;;  %v229_v57 = vmul.f32 %v3106_v56, %v3106_v56  ;;  %v210_v3 = vmul.f32 %v3115_v17, %v3115_v17  ;;  %v4440_v34 = vld [vmem:[#allocation46_spill] sm:$0xff] }
  0x61   :  { %523 = vadd.xlane.f32.xlu0 %v522_v49  ;;  %v293_v31 = vadd.f32 %v292_v52, %v227_v13  ;;  %v495_v24 = vmul.f32 %v4436_v30, %v4436_v30  ;;  %v559_v2 = vadd.f32 %v493_v26, %v492_v23  ;;  %v230_v44 = vmul.f32 %v4437_v35, %v4437_v35  ;;  %v4441_v23 = vld [vmem:[#allocation47_spill] sm:$0xff]  ;;  %v4444_v30 = vld [vmem:[#allocation53_spill] sm:$0xff] }
  0x62   :  { %540 = vadd.xlane.f32.xlu1 %v539_v36  ;;  %v273_v11 = vadd.f32 %v272_v48, %v208_v61  ;;  %v211_v25 = vmul.f32 %v4438_v4, %v4438_v4  ;;  %v496_v56 = vmul.f32 %v4439_v19, %v4439_v19  ;;  %v231_v22 = vmul.f32 %v3153_v6, %v3153_v6 }
  0x63   :  { %v294_v29 = vadd.f32 %v293_v31, %v228_v28  ;;  %v560_v13 = vadd.f32 %v559_v2, %v494_v1  ;;  %v476_v54 = vmul.f32 %v4440_v34, %v4440_v34  ;;  %v477_v0 = vmul.f32 %v4441_v23, %v4441_v23 }
  0x64   :  { %v274_v15 = vadd.f32 %v273_v11, %v209_v53  ;;  %v212_v26 = vmul.f32 %v3155_v62, %v3155_v62  ;;  %v497_v28 = vmul.f32 %v4442_v10, %v4442_v10  ;;  %v232_v36 = vmul.f32 %v3172_v42, %v3172_v42  ;;  %v4443_v53 = vld [vmem:[#allocation50_spill] sm:$0xff] }
  0x65   :  { %v295_v61 = vadd.f32 %v294_v29, %v229_v57  ;;  %v561_v52 = vadd.f32 %v560_v13, %v495_v24  ;;  %v478_v48 = vmul.f32 %v4443_v53, %v4443_v53  ;;  %v213_v60 = vmul.f32 %v3174_v40, %v3174_v40  ;;  %v4446_v13 = vld [vmem:[#allocation55_spill] sm:$0xff] }
  0x66   :  { %v275_v49 = vadd.f32 %v274_v15, %v210_v3  ;;  %v498_v57 = vmul.f32 %v3149_v39, %v3149_v39  ;;  %v233_v3 = vmul.f32 %v3188_v47, %v3188_v47  ;;  %v479_v24 = vmul.f32 %v4444_v30, %v4444_v30  ;;  %v4445_v15 = vld [vmem:[#allocation57_spill] sm:$0xff] }
  0x67   :  { %v296_v8 = vadd.f32 %v295_v61, %v230_v44  ;;  %v562_v31 = vadd.f32 %v561_v52, %v496_v56  ;;  %v542_v2 = vadd.f32 %v477_v0, %v476_v54  ;;  %v214_v44 = vmul.f32 %v3190_v12, %v3190_v12 }
  0x68   :  { %v276_v1 = vadd.f32 %v275_v49, %v211_v25  ;;  %v499_v19 = vmul.f32 %v4445_v15, %v4445_v15  ;;  %v234_v39 = vmul.f32 %v3204_v38, %v3204_v38  ;;  %v480_v61 = vmul.f32 %v4446_v13, %v4446_v13  ;;  %v4447_v49 = vld [vmem:[#allocation58_spill] sm:$0xff] }
  0x69   :  { %v297_v11 = vadd.f32 %v296_v8, %v231_v22  ;;  %v563_v25 = vadd.f32 %v562_v31, %v497_v28  ;;  %v543_v22 = vadd.f32 %v542_v2, %v478_v48  ;;  %v215_v34 = vmul.f32 %v3206_v33, %v3206_v33 }
  0x6a   :  { %v277_v29 = vadd.f32 %v276_v1, %v212_v26  ;;  %v500_v23 = vmul.f32 %v3182_v27, %v3182_v27  ;;  %v481_v10 = vmul.f32 %v4447_v49, %v4447_v49  ;;  %v216_v52 = vmul.f32 %v3221_v14, %v3221_v14  ;;  %v4448_v1 = vld [vmem:[#allocation59_spill] sm:$0xff] }
  0x6b   :  { %v298_v56 = vadd.f32 %v297_v11, %v232_v36  ;;  %v564_v0 = vadd.f32 %v563_v25, %v498_v57  ;;  %v544_v28 = vadd.f32 %v543_v22, %v479_v24  ;;  %v501_v8 = vmul.f32 %v3199_v20, %v3199_v20 }
  0x6c   :  { %v278_v54 = vadd.f32 %v277_v29, %v213_v60  ;;  %v482_v60 = vmul.f32 %v4448_v1, %v4448_v1  ;;  %v217_v27 = vmul.f32 %v3237_v50, %v3237_v50  ;;  %v483_v30 = vmul.f32 %v3209_v63, %v3209_v63 }
  0x6d   :  { %v299_v26 = vadd.f32 %v298_v56, %v233_v3  ;;  %v565_v53 = vadd.f32 %v564_v0, %v499_v19  ;;  %v545_v31 = vadd.f32 %v544_v28, %v480_v61  ;;  %v502_v3 = vmul.f32 %v3216_v9, %v3216_v9 }
  0x6e   :  { %v279_v36 = vadd.f32 %v278_v54, %v214_v44  ;;  %v218_v20 = vmul.f32 %v3250_v21, %v3250_v21  ;;  %v503_v44 = vmul.f32 %v3233_v32, %v3233_v32  ;;  %v484_v15 = vmul.f32 %v3224_v37, %v3224_v37 }
  0x6f   :  { %v300_v48 = vadd.f32 %v299_v26, %v234_v39  ;;  %v566_v11 = vadd.f32 %v565_v53, %v500_v23  ;;  %v546_v24 = vadd.f32 %v545_v31, %v481_v10  ;;  %v504_v9 = vmul.f32 %v3244_v7, %v3244_v7 }
  0x70   :  { %v280_v57 = vadd.f32 %v279_v36, %v215_v34  ;;  %v485_v63 = vmul.f32 %v3240_v43, %v3240_v43  ;;  %v505_v61 = vmul.f32 %v3260_v55, %v3260_v55  ;;  %v486_v32 = vmul.f32 %v3253_v5, %v3253_v5 }
  0x71   :  { %301 = vadd.xlane.f32.xlu1 %v300_v48  ;;  %v567_v29 = vadd.f32 %v566_v11, %v501_v8  ;;  %v547_v19 = vadd.f32 %v546_v24, %v482_v60  ;;  %v506_v37 = vmul.f32 %v3271_v59, %v3271_v59  ;;  %v487_v7 = vmul.f32 %v3267_v51, %v3267_v51 }
  0x72   :  { %v281_v2 = vadd.f32 %v280_v57, %v216_v52  ;;  %v507_v43 = vmul.f32 %v3284_v45, %v3284_v45  ;;  %v488_v55 = vmul.f32 %v3278_v16, %v3278_v16  ;;  %v489_v5 = vmul.f32 %v3293_v41, %v3293_v41 }
  0x73   :  { %v568_v39 = vadd.f32 %v567_v29, %v502_v3  ;;  %v548_v56 = vadd.f32 %v547_v19, %v483_v30  ;;  %v490_v59 = vmul.f32 %v3303_v46, %v3303_v46  ;;  %v491_v51 = vmul.f32 %v3313_v18, %v3313_v18 }
  0x74   :  { %v282_v25 = vadd.f32 %v281_v2, %v217_v27  ;;  %v2846_v16 = vmov 0  }
  0x75   :  { %v569_v22 = vadd.f32 %v568_v39, %v503_v44  ;;  %v549_v34 = vadd.f32 %v548_v56, %v484_v15  ;;  %2746 = vset.pattern.permute.xlu1 %v2846_v16  ;;  %2745 = vset.pattern.permute.xlu0 %v2846_v16 }
  0x76   :  { %v283_v13 = vadd.f32 %v282_v25, %v218_v20 }
  0x77   :  { %v570_v54 = vadd.f32 %v569_v22, %v504_v9  ;;  %v550_v23 = vadd.f32 %v549_v34, %v485_v63  ;;  %v601_v34 = vld [vmem:[%s4294_s0 + $0x8] sm:$0xff] }
  0x78   :  { %284 = vadd.xlane.f32.xlu0 %v283_v13 }
  0x79   :  { %v571_v0 = vadd.f32 %v570_v54, %v505_v61  ;;  %v551_v26 = vadd.f32 %v550_v23, %v486_v32  ;;  %v600_v32 = vld [vmem:[%s4294_s0] sm:$0xff] }
  0x7b   :  { %v572_v49 = vadd.f32 %v571_v0, %v506_v37  ;;  %v552_v10 = vadd.f32 %v551_v26, %v487_v7  ;;  %v631_v0 = vld [vmem:[%s4297_s3 + $0x8] sm:$0xff] }
  0x7d   :  { %v573_v28 = vadd.f32 %v572_v49, %v507_v43  ;;  %v553_v52 = vadd.f32 %v552_v10, %v488_v55 }
  0x7f   :  { %574 = vadd.xlane.f32.xlu1 %v573_v28  ;;  %v554_v45 = vadd.f32 %v553_v52, %v489_v5 }
  0x81   :  { %v555_v36 = vadd.f32 %v554_v45, %v490_v59 }
  0x83   :  { %v556_v8 = vadd.f32 %v555_v36, %v491_v51 }
  0x85   :  { %557 = vadd.xlane.f32.xlu0 %v556_v8 }
  0xbf   :  { %v388_v53 = vpop.xlane.xlu1 %387 }
  0xc3   :  { %v115_v48 = vpop.xlane.xlu0 %114 }
  0xc4   :  { %v440_v57 = vadd.f32 %v388_v53, %v115_v48 }
  0xc6   :  { %v580_v18 = vmul.f32 0.00024414063, %v440_v57 }
  0xc8   :  { %v588_v15 = vmul.f32 %v580_v18, %v580_v18 }
  0xcb   :  { %v405_v41 = vpop.xlane.xlu1 %404 }
  0xd0   :  { %v132_v1 = vpop.xlane.xlu0 %131 }
  0xd1   :  { %v441_v11 = vadd.f32 %v405_v41, %v132_v1 }
  0xd3   :  { %v581_v24 = vmul.f32 0.00024414063, %v441_v11  ;;  %v603_v11 = vld [vmem:[%s4294_s0 + $0x18] sm:$0xff] }
  0xd5   :  { %v166_v60 = vpop.xlane.xlu1 %165  ;;  %v589_v25 = vmul.f32 %v581_v24, %v581_v24 }
  0xdc   :  { %v149_v31 = vpop.xlane.xlu0 %148 }
  0xe1   :  { %v439_v27 = vpop.xlane.xlu1 %438 }
  0xe2   :  { %v443_v55 = vadd.f32 %v439_v27, %v166_v60  ;;  %v602_v60 = vld [vmem:[%s4294_s0 + $0x10] sm:$0xff] }
  0xe4   :  { %v583_v10 = vmul.f32 0.00024414063, %v443_v55  ;;  %v2759_v55 = vld [vmem:[#allocation2 + $0x88] sm:$0xff] }
  0xe5   :  { %v268_v3 = vpop.xlane.xlu1 %267 }
  0xe6   :  { %v422_v46 = vpop.xlane.xlu0 %421  ;;  %v591_v52 = vmul.f32 %v583_v10, %v583_v10 }
  0xe7   :  { %v442_v28 = vadd.f32 %v422_v46, %v149_v31 }
  0xe9   :  { %v582_v51 = vmul.f32 0.00024414063, %v442_v28 }
  0xea   :  { %v251_v30 = vpop.xlane.xlu0 %250 }
  0xeb   :  { %v590_v16 = vmul.f32 %v582_v51, %v582_v51 }
  0xee   :  { %v524_v20 = vpop.xlane.xlu0 %523 }
  0xef   :  { %v541_v2 = vpop.xlane.xlu1 %540  ;;  %v576_v44 = vadd.f32 %v524_v20, %v251_v30 }
  0xf0   :  { %v577_v29 = vadd.f32 %v541_v2, %v268_v3  ;;  %v616_v2 = vld [vmem:[%s4295_s1] sm:$0xff] }
  0xf1   :  { %v584_v19 = vmul.f32 0.00024414063, %v576_v44 }
  0xf2   :  { %v585_v9 = vmul.f32 0.00024414063, %v577_v29 }
  0xf3   :  { %v592_v39 = vsub.f32 %v584_v19, %v588_v15  ;;  %v617_v15 = vld [vmem:[%s4295_s1 + $0x8] sm:$0xff] }
  0xf4   :  { %v593_v63 = vsub.f32 %v585_v9, %v589_v25  ;;  %v618_v9 = vld [vmem:[%s4295_s1 + $0x10] sm:$0xff] }
  0xf5   :  { %v596_v56 = vmax.f32 %v592_v39, 0.0 }
  0xf6   :  { %v597_v13 = vmax.f32 %v593_v63, 0.0  ;;  %v619_v63 = vld [vmem:[%s4295_s1 + $0x18] sm:$0xff] }
  0xf7   :  { %v604_v61 = vadd.f32 1e-05, %v596_v56  ;;  %v630_v56 = vld [vmem:[%s4297_s3] sm:$0xff] }
  0xf8   :  { %v605_v22 = vadd.f32 1e-05, %v597_v13  ;;  %v4350_v13 = vmov 0.0  }
  0xf9   :  { %2747 = vrsqrt.f32 %v604_v61  ;;  %1009 = vmatprep.mubr.f32.mxu0 %v4350_v13  ;;  %1086 = vmatprep.mubr.f32.mxu1 %v4350_v13 }
  0xfa   :  { %2749 = vrsqrt.f32 %v605_v22 }
  0xfe   :  { %v302_v43 = vpop.xlane.xlu1 %301 }
 0x103   :  { %v2748_v37 = vpop.eup %2747 }
 0x104   :  { %v2750_v54 = vpop.eup %2749  ;;  %v612_v7 = vmul.f32 %v2748_v37, %v600_v32  ;;  %v2755_v32 = vld [vmem:[#allocation2 + $0x8] sm:$0xff]  ;;  %v2756_v37 = vld [vmem:[#allocation2 + $0x18] sm:$0xff] }
 0x105   :  { %v613_v23 = vmul.f32 %v2750_v54, %v601_v34  ;;  %v285_v49 = vpop.xlane.xlu0 %284 }
 0x106   :  { %634 = vperm.xlu0 %2745, %v612_v7   ;;  %v620_v20 = vmul.f32 %v612_v7, %v580_v18  ;;  %v2757_v7 = vld [vmem:[#allocation2] sm:$0xff] }
 0x107   :  { %639 = vperm.xlu1 %2746, %v613_v23   ;;  %v621_v29 = vmul.f32 %v613_v23, %v581_v24 }
 0x108   :  { %v624_v44 = vsub.f32 %v616_v2, %v620_v20  ;;  %v1610_v20 = vld [vmem:[#allocation2 + $0x288] sm:$0xff]  ;;  %v1596_v2 = vld [vmem:[#allocation2 + $0x218] sm:$0xff] }
 0x109   :  { %v625_v19 = vsub.f32 %v617_v15, %v621_v29  ;;  %v2769_v29 = vld [vmem:[#allocation2 + $0x48] sm:$0xff] }
 0x10a   :  { %935 = vperm.xlu0 %2745, %v631_v0  }
 0x10c   :  { %v575_v26 = vpop.xlane.xlu1 %574 }
 0x10d   :  { %v579_v5 = vadd.f32 %v575_v26, %v302_v43  ;;  %v2758_v43 = vld [vmem:[#allocation2 + $0x10] sm:$0xff] }
 0x10f   :  { %v587_v59 = vmul.f32 0.00024414063, %v579_v5 }
 0x111   :  { %v595_v36 = vsub.f32 %v587_v59, %v591_v52  ;;  %v2762_v59 = vld [vmem:[#allocation2 + $0x90] sm:$0xff] }
 0x112   :  { %v558_v45 = vpop.xlane.xlu0 %557 }
 0x113   :  { %v578_v8 = vadd.f32 %v558_v45, %v285_v49  ;;  %v599_v48 = vmax.f32 %v595_v36, 0.0  ;;  %v2760_v49 = vld [vmem:[#allocation2 + $0x98] sm:$0xff]  ;;  %v2764_v36 = vld [vmem:[#allocation2 + $0xa8] sm:$0xff] }
 0x115   :  { %v586_v53 = vmul.f32 0.00024414063, %v578_v8  ;;  %v607_v57 = vadd.f32 1e-05, %v599_v48  ;;  %v4449_v48 = vld [vmem:[#allocation19_spill] sm:$0xff] }
 0x117   :  { %v594_v41 = vsub.f32 %v586_v53, %v590_v16  ;;  %v2765_v16 = vld [vmem:[#allocation2 + $0x38] sm:$0xff] }
 0x119   :  { %v598_v1 = vmax.f32 %v594_v41, 0.0 }
 0x11b   :  { %v606_v3 = vadd.f32 1e-05, %v598_v1  ;;  %v2766_v1 = vld [vmem:[#allocation2 + $0x20] sm:$0xff] }
 0x11d   :  { %2751 = vrsqrt.f32 %v606_v3  ;;  %v2767_v3 = vld [vmem:[#allocation2 + $0xa0] sm:$0xff] }
 0x11e   :  { %2753 = vrsqrt.f32 %v607_v57 }
 0x127   :  { %v2752_v31 = vpop.eup %2751 }
 0x128   :  { %v614_v27 = vmul.f32 %v2752_v31, %v602_v60  ;;  %v2754_v46 = vpop.eup %2753  ;;  %v2768_v31 = vld [vmem:[#allocation2 + $0x30] sm:$0xff] }
 0x129   :  { %v615_v30 = vmul.f32 %v2754_v46, %v603_v11  ;;  %v4450_v46 = vld [vmem:[#allocation15_spill] sm:$0xff] }
 0x12a   :  { %644 = vperm.xlu1 %2746, %v614_v27   ;;  %v622_v25 = vmul.f32 %v614_v27, %v582_v51  ;;  %v2763_v51 = vld [vmem:[#allocation2 + $0x28] sm:$0xff] }
 0x12b   :  { %v623_v39 = vmul.f32 %v615_v30, %v583_v10  ;;  %v2761_v10 = vld [vmem:[#allocation2 + $0x80] sm:$0xff] }
 0x12c   :  { %v626_v18 = vsub.f32 %v618_v9, %v622_v25  ;;  %v2770_v9 = vld [vmem:[#allocation2 + $0x58] sm:$0xff] }
 0x12d   :  { %v627_v24 = vsub.f32 %v619_v63, %v623_v39  ;;  %v4452_v39 = vld [vmem:[#allocation40_spill] sm:$0xff] }
 0x12e   :  { %649 = vperm.xlu1 %2746, %v615_v30   ;;  %v1594_v30 = vld [vmem:[#allocation2 + $0x208] sm:$0xff] }
 0x132   :  { %718 = vperm.xlu1 %2746, %v624_v44   ;;  %v1612_v44 = vld [vmem:[#allocation2 + $0x298] sm:$0xff] }
 0x136   :  { %723 = vperm.xlu1 %2746, %v625_v19   ;;  %v4451_v19 = vld [vmem:[#allocation30_spill] sm:$0xff] }
 0x13a   :  { %728 = vperm.xlu1 %2746, %v626_v18  }
 0x13e   :  { %733 = vperm.xlu1 %2746, %v627_v24   ;;  %v1593_v24 = vld [vmem:[#allocation2 + $0x200] sm:$0xff] }
 0x142   :  { %930 = vperm.xlu1 %2746, %v630_v56   ;;  %v1609_v56 = vld [vmem:[#allocation2 + $0x280] sm:$0xff] }
 0x185   :  { %v3486_v61 = vpop.permute.xlu0 %634 }
 0x186   :  { %v3488_v22 = vpop.permute.xlu1 %639  ;;  %v3491_v34 = vmul.f32 %v2755_v32, %v3486_v61  ;;  %v3494_v54 = vmul.f32 %v2756_v37, %v3486_v61  ;;  %v3497_v23 = vmul.f32 %v2757_v7, %v3486_v61  ;;  %v3500_v0 = vmul.f32 %v2758_v43, %v3486_v61  ;;  %v1595_v32 = vld [vmem:[#allocation2 + $0x210] sm:$0xff]  ;;  %v2771_v7 = vld [vmem:[#allocation2 + $0x40] sm:$0xff] }
 0x187   :  { %v3503_v26 = vmul.f32 %v2759_v55, %v3488_v22  ;;  %v3506_v5 = vmul.f32 %v2760_v49, %v3488_v22  ;;  %v3509_v28 = vmul.f32 %v2761_v10, %v3488_v22  ;;  %v3512_v52 = vmul.f32 %v2762_v59, %v3488_v22  ;;  %v1611_v37 = vld [vmem:[#allocation2 + $0x290] sm:$0xff]  ;;  %v4453_v55 = vld [vmem:[#allocation25_spill] sm:$0xff] }
 0x188   :  { %v3515_v45 = vmul.f32 %v2763_v51, %v3486_v61  ;;  %v3518_v8 = vmul.f32 %v2764_v36, %v3488_v22  ;;  %v3521_v53 = vmul.f32 %v2765_v16, %v3486_v61  ;;  %v3525_v41 = vmul.f32 %v3488_v22, %v4449_v48  ;;  %v2772_v10 = vld [vmem:[#allocation2 + $0x50] sm:$0xff]  ;;  %v4455_v51 = vld [vmem:[#allocation31_spill] sm:$0xff]  ;;  %v1598_v16 = vld [vmem:[#allocation2 + $0x228] sm:$0xff] }
 0x189   :  { %v3528_v57 = vmul.f32 %v2766_v1, %v3486_v61  ;;  %v3531_v60 = vmul.f32 %v2767_v3, %v3488_v22  ;;  %v3534_v27 = vmul.f32 %v2768_v31, %v3486_v61  ;;  %v3538_v11 = vmul.f32 %v3488_v22, %v4450_v46  ;;  %v1614_v48 = vld [vmem:[#allocation2 + $0x2a8] sm:$0xff]  ;;  %v1600_v1 = vld [vmem:[#allocation2 + $0x238] sm:$0xff]  ;;  %v4458_v46 = vld [vmem:[#allocation48_spill] sm:$0xff] }
 0x18a   :  { %v3541_v15 = vmul.f32 %v2769_v29, %v3486_v61  ;;  %v3545_v25 = vmul.f32 %v3488_v22, %v4451_v19  ;;  %v3548_v18 = vmul.f32 %v2770_v9, %v3486_v61  ;;  %v3552_v63 = vmul.f32 %v3488_v22, %v4452_v39  ;;  %v2773_v3 = vld [vmem:[#allocation2 + $0x68] sm:$0xff]  ;;  %v4461_v9 = vld [vmem:[#allocation56_spill] sm:$0xff] }
 0x18b   :  { %v3555_v43 = vmul.f32 %v2771_v7, %v3486_v61  ;;  %v3559_v49 = vmul.f32 %v3488_v22, %v4453_v55  ;;  %v3562_v59 = vmul.f32 %v2772_v10, %v3486_v61  ;;  %v3566_v36 = vmul.f32 %v3488_v22, %v4455_v51  ;;  %v1616_v7 = vld [vmem:[#allocation2 + $0x2b8] sm:$0xff]  ;;  %v1597_v55 = vld [vmem:[#allocation2 + $0x220] sm:$0xff] }
 0x18c   :  { %v3569_v31 = vmul.f32 %v2773_v3, %v3486_v61  ;;  %v3573_v29 = vmul.f32 %v3488_v22, %v4458_v46  ;;  %v3577_v19 = vmul.f32 %v3486_v61, %v3043_v58  ;;  %v3581_v39 = vmul.f32 %v3488_v22, %v4461_v9  ;;  %v1613_v10 = vld [vmem:[#allocation2 + $0x2a0] sm:$0xff]  ;;  %v4468_v58 = vld [vmem:[#allocation54_spill] sm:$0xff] }
 0x18d   :  { %4454 = vst [vmem:[#allocation12_spill] sm:$0xff] %v3562_v59  ;;  %4456 = vst [vmem:[#allocation18_spill] sm:$0xff] %v3566_v36  ;;  %v2774_v51 = vld [vmem:[#allocation2 + $0x60] sm:$0xff]  ;;  %v1599_v9 = vld [vmem:[#allocation2 + $0x230] sm:$0xff]  ;;  %v3599_v59 = vmul.f32 %v1594_v30, %v3486_v61  ;;  %v3617_v30 = vmul.f32 %v1595_v32, %v3486_v61 }
 0x18e   :  { %4457 = vst [vmem:[#allocation8_spill] sm:$0xff] %v3569_v31  ;;  %4459 = vst [vmem:[#allocation13_spill] sm:$0xff] %v3573_v29  ;;  %v3584_v13 = vmul.f32 %v2774_v51, %v3486_v61  ;;  %v4464_v3 = vld [vmem:[#allocation44_spill] sm:$0xff]  ;;  %v1602_v36 = vld [vmem:[#allocation2 + $0x248] sm:$0xff]  ;;  %v3602_v51 = vmul.f32 %v1610_v20, %v3488_v22  ;;  %v3620_v20 = vmul.f32 %v1611_v37, %v3488_v22 }
 0x18f   :  { %4460 = vst [vmem:[#allocation26_spill] sm:$0xff] %v3577_v19  ;;  %4462 = vst [vmem:[#allocation9_spill] sm:$0xff] %v3581_v39  ;;  %v3588_v31 = vmul.f32 %v3488_v22, %v4464_v3  ;;  %v4466_v46 = vld [vmem:[#allocation24_spill] sm:$0xff]  ;;  %v3596_v19 = vmul.f32 %v3488_v22, %v4468_v58  ;;  %v1615_v39 = vld [vmem:[#allocation2 + $0x2b0] sm:$0xff]  ;;  %v3605_v3 = vmul.f32 %v1596_v2, %v3486_v61 }
 0x190   :  { %4463 = vst [vmem:[#allocation17_spill] sm:$0xff] %v3584_v13  ;;  %v3592_v29 = vmul.f32 %v3486_v61, %v4466_v46  ;;  %4470 = vst [vmem:[#allocation10_spill] sm:$0xff] %v3599_v59  ;;  %v1618_v46 = vld [vmem:[#allocation2 + $0x2c8] sm:$0xff]  ;;  %v1620_v13 = vld [vmem:[#allocation2 + $0x2d8] sm:$0xff]  ;;  %v3611_v58 = vmul.f32 %v1593_v24, %v3486_v61  ;;  %v3629_v24 = vmul.f32 %v1600_v1, %v3486_v61 }
 0x191   :  { %4465 = vst [vmem:[#allocation29_spill] sm:$0xff] %v3588_v31  ;;  %4469 = vst [vmem:[#allocation22_spill] sm:$0xff] %v3596_v19  ;;  %v3608_v31 = vmul.f32 %v1612_v44, %v3488_v22  ;;  %v3614_v19 = vmul.f32 %v1609_v56, %v3488_v22  ;;  %v1601_v2 = vld [vmem:[#allocation2 + $0x240] sm:$0xff]  ;;  %v3623_v44 = vmul.f32 %v1598_v16, %v3486_v61  ;;  %v1619_v32 = vld [vmem:[#allocation2 + $0x2d0] sm:$0xff] }
 0x192   :  { %4467 = vst [vmem:[#allocation20_spill] sm:$0xff] %v3592_v29  ;;  %4471 = vst [vmem:[#allocation21_spill] sm:$0xff] %v3602_v51  ;;  %v1604_v29 = vld [vmem:[#allocation2 + $0x258] sm:$0xff]  ;;  %v1603_v51 = vld [vmem:[#allocation2 + $0x250] sm:$0xff]  ;;  %v3632_v56 = vmul.f32 %v1616_v7, %v3488_v22  ;;  %v3635_v37 = vmul.f32 %v1597_v55, %v3486_v61  ;;  %v3641_v16 = vmul.f32 %v1599_v9, %v3486_v61 }
 0x193   :  { %4472 = vst [vmem:[#allocation14_spill] sm:$0xff] %v3605_v3  ;;  %4473 = vst [vmem:[#allocation23_spill] sm:$0xff] %v3608_v31  ;;  %v1617_v3 = vld [vmem:[#allocation2 + $0x2c0] sm:$0xff]  ;;  %v3626_v31 = vmul.f32 %v1614_v48, %v3488_v22  ;;  %v3644_v48 = vmul.f32 %v1615_v39, %v3488_v22  ;;  %v1608_v1 = vld [vmem:[#allocation2 + $0x278] sm:$0xff]  ;;  %v3647_v7 = vmul.f32 %v1602_v36, %v3486_v61 }
 0x194   :  { %4474 = vst [vmem:[#allocation11_spill] sm:$0xff] %v3611_v58  ;;  %4475 = vst [vmem:[#allocation27_spill] sm:$0xff] %v3614_v19  ;;  %v1622_v19 = vld [vmem:[#allocation2 + $0x2e8] sm:$0xff]  ;;  %v3653_v55 = vmul.f32 %v1604_v29, %v3486_v61  ;;  %v1621_v9 = vld [vmem:[#allocation2 + $0x2e0] sm:$0xff]  ;;  %v3659_v39 = vmul.f32 %v1601_v2, %v3486_v61  ;;  %v3665_v36 = vmul.f32 %v1603_v51, %v3486_v61 }
 0x195   :  { %4476 = vst [vmem:[#allocation39_spill] sm:$0xff] %v3617_v30  ;;  %4477 = vst [vmem:[#allocation28_spill] sm:$0xff] %v3620_v20  ;;  %v1606_v30 = vld [vmem:[#allocation2 + $0x268] sm:$0xff]  ;;  %v3638_v20 = vmul.f32 %v1613_v10, %v3488_v22  ;;  %v3656_v10 = vmul.f32 %v1620_v13, %v3488_v22  ;;  %v3674_v13 = vmul.f32 %v1622_v19, %v3488_v22 }
 0x196   :  { %4478 = vst [vmem:[#allocation16_spill] sm:$0xff] %v3623_v44  ;;  %4479 = vst [vmem:[#allocation32_spill] sm:$0xff] %v3626_v31  ;;  %v1605_v31 = vld [vmem:[#allocation2 + $0x260] sm:$0xff]  ;;  %v3671_v29 = vmul.f32 %v1606_v30, %v3486_v61 }
 0x197   :  { %4480 = vst [vmem:[#allocation33_spill] sm:$0xff] %v3629_v24  ;;  %4481 = vst [vmem:[#allocation37_spill] sm:$0xff] %v3632_v56  ;;  %v1624_v24 = vld [vmem:[#allocation2 + $0x2f8] sm:$0xff]  ;;  %v3650_v56 = vmul.f32 %v1618_v46, %v3488_v22  ;;  %v3668_v46 = vmul.f32 %v1619_v32, %v3488_v22  ;;  %v3685_v51 = vmul.f32 %v1605_v31, %v3486_v61 }
 0x198   :  { %4482 = vst [vmem:[#allocation38_spill] sm:$0xff] %v3635_v37  ;;  %4483 = vst [vmem:[#allocation34_spill] sm:$0xff] %v3638_v20  ;;  %v1623_v20 = vld [vmem:[#allocation2 + $0x2f0] sm:$0xff]  ;;  %v3680_v2 = vmul.f32 %v1624_v24, %v3488_v22  ;;  %v3688_v32 = vmul.f32 %v1621_v9, %v3488_v22  ;;  %v2776_v24 = vld [vmem:[#allocation2 + $0x118] sm:$0xff] }
 0x199   :  { %4484 = vst [vmem:[#allocation35_spill] sm:$0xff] %v3641_v16  ;;  %4485 = vst [vmem:[#allocation42_spill] sm:$0xff] %v3644_v48  ;;  %v1607_v16 = vld [vmem:[#allocation2 + $0x270] sm:$0xff]  ;;  %v3662_v48 = vmul.f32 %v1617_v3, %v3488_v22  ;;  %v3694_v19 = vmul.f32 %v1623_v20, %v3488_v22 }
 0x19a   :  { %4486 = vst [vmem:[#allocation43_spill] sm:$0xff] %v3647_v7  ;;  %4487 = vst [vmem:[#allocation36_spill] sm:$0xff] %v3650_v56  ;;  %v3691_v30 = vmul.f32 %v1607_v16, %v3486_v61  ;;  %v2778_v9 = vld [vmem:[#allocation2 + $0x110] sm:$0xff]  ;;  %v2780_v16 = vld [vmem:[#allocation2 + $0x120] sm:$0xff] }
 0x19b   :  { %4488 = vst [vmem:[#allocation41_spill] sm:$0xff] %v3653_v55  ;;  %4489 = vst [vmem:[#allocation51_spill] sm:$0xff] %v3656_v10  ;;  %v3677_v10 = vmul.f32 %v1608_v1, %v3486_v61  ;;  %v2779_v61 = vld [vmem:[#allocation2 + $0x128] sm:$0xff]  ;;  %v2789_v55 = vld [vmem:[#allocation2 + $0x1b0] sm:$0xff] }
 0x19c   :  { %4490 = vst [vmem:[#allocation52_spill] sm:$0xff] %v3659_v39  ;;  %4491 = vst [vmem:[#allocation45_spill] sm:$0xff] %v3662_v48  ;;  %v2787_v48 = vld [vmem:[#allocation2 + $0x1b8] sm:$0xff]  ;;  %v2788_v39 = vld [vmem:[#allocation2 + $0x1a0] sm:$0xff] }
 0x19d   :  { %4492 = vst [vmem:[#allocation46_spill] sm:$0xff] %v3665_v36  ;;  %4493 = vst [vmem:[#allocation47_spill] sm:$0xff] %v3668_v46  ;;  %v2785_v46 = vld [vmem:[#allocation2 + $0x190] sm:$0xff]  ;;  %v2786_v36 = vld [vmem:[#allocation2 + $0x1a8] sm:$0xff] }
 0x19e   :  { %4494 = vst [vmem:[#allocation49_spill] sm:$0xff] %v3671_v29  ;;  %4495 = vst [vmem:[#allocation50_spill] sm:$0xff] %v3674_v13  ;;  %v2775_v13 = vld [vmem:[#allocation2 + $0x108] sm:$0xff]  ;;  %v2784_v29 = vld [vmem:[#allocation2 + $0x180] sm:$0xff] }
 0x19f   :  { %4496 = vst [vmem:[#allocation53_spill] sm:$0xff] %v3677_v10  ;;  %4497 = vst [vmem:[#allocation57_spill] sm:$0xff] %v3680_v2  ;;  %v2777_v10 = vld [vmem:[#allocation2 + $0x100] sm:$0xff]  ;;  %v2790_v56 = vld [vmem:[#allocation2 + $0x1c8] sm:$0xff] }
 0x1a0   :  { %4499 = vst [vmem:[#allocation58_spill] sm:$0xff] %v3685_v51  ;;  %4500 = vst [vmem:[#allocation59_spill] sm:$0xff] %v3688_v32  ;;  %v2783_v51 = vld [vmem:[#allocation2 + $0x198] sm:$0xff]  ;;  %v2791_v7 = vld [vmem:[#allocation2 + $0x1c0] sm:$0xff] }
 0x1a1   :  { %4501 = vst [vmem:[#allocation19_spill] sm:$0xff] %v3691_v30  ;;  %4502 = vst [vmem:[#allocation15_spill] sm:$0xff] %v3694_v19  ;;  %v2792_v37 = vld [vmem:[#allocation2 + $0x1d0] sm:$0xff] }
 0x1a9   :  { %v3682_v3 = vpop.permute.xlu1 %644 }
 0x1aa   :  { %4498 = vst [vmem:[#allocation55_spill] sm:$0xff] %v3682_v3  ;;  %v3697_v1 = vmul.f32 %v2775_v13, %v3682_v3  ;;  %v3700_v2 = vmul.f32 %v2776_v24, %v3682_v3  ;;  %v3703_v31 = vmul.f32 %v2777_v10, %v3682_v3  ;;  %v3706_v32 = vmul.f32 %v2778_v9, %v3682_v3  ;;  %v2781_v24 = vld [vmem:[#allocation2 + $0x130] sm:$0xff] }
 0x1ab   :  { %v3709_v22 = vmul.f32 %v2779_v61, %v3682_v3  ;;  %v3713_v20 = vmul.f32 %v3682_v3, %v3115_v17  ;;  %v3716_v13 = vmul.f32 %v2780_v16, %v3682_v3  ;;  %v3719_v10 = vmul.f32 %v2781_v24, %v3682_v3 }
 0x1ac   :  { %v3723_v9 = vmul.f32 %v3682_v3, %v3155_v62  ;;  %v3727_v61 = vmul.f32 %v3682_v3, %v3190_v12  ;;  %v3731_v17 = vmul.f32 %v3682_v3, %v4438_v4  ;;  %v3735_v16 = vmul.f32 %v3682_v3, %v3174_v40  ;;  %v2782_v40 = vld [vmem:[#allocation2 + $0x188] sm:$0xff] }
 0x1ad   :  { %v3737_v19 = vpop.permute.xlu1 %649  ;;  %v3741_v24 = vmul.f32 %v3682_v3, %v3221_v14  ;;  %v3745_v62 = vmul.f32 %v3682_v3, %v3250_v21  ;;  %v3749_v12 = vmul.f32 %v3682_v3, %v3206_v33  ;;  %v3753_v4 = vmul.f32 %v3682_v3, %v3237_v50 }
 0x1ae   :  { %4503 = vst [vmem:[#allocation30_spill] sm:$0xff] %v3735_v16  ;;  %4504 = vst [vmem:[#allocation40_spill] sm:$0xff] %v3737_v19  ;;  %v3756_v30 = vmul.f32 %v2782_v40, %v3737_v19  ;;  %v3759_v14 = vmul.f32 %v2783_v51, %v3737_v19  ;;  %v3762_v21 = vmul.f32 %v2784_v29, %v3737_v19 }
 0x1af   :  { %4505 = vst [vmem:[#allocation25_spill] sm:$0xff] %v3741_v24  ;;  %4506 = vst [vmem:[#allocation31_spill] sm:$0xff] %v3745_v62  ;;  %v3765_v33 = vmul.f32 %v2785_v46, %v3737_v19  ;;  %v3768_v50 = vmul.f32 %v2786_v36, %v3737_v19  ;;  %v3771_v40 = vmul.f32 %v2787_v48, %v3737_v19 }
 0x1b0   :  { %4507 = vst [vmem:[#allocation48_spill] sm:$0xff] %v3749_v12  ;;  %4508 = vst [vmem:[#allocation56_spill] sm:$0xff] %v3753_v4  ;;  %v3774_v51 = vmul.f32 %v2788_v39, %v3737_v19  ;;  %v3777_v29 = vmul.f32 %v2789_v55, %v3737_v19  ;;  %v3780_v46 = vmul.f32 %v2790_v56, %v3737_v19 }
 0x1b1   :  { %v3784_v36 = vmul.f32 %v3737_v19, %v4437_v35  ;;  %v3787_v48 = vmul.f32 %v2791_v7, %v3737_v19  ;;  %v3790_v39 = vmul.f32 %v2792_v37, %v3737_v19  ;;  %v3792_v44 = vpop.permute.xlu1 %718  ;;  %v3796_v55 = vmul.f32 %v3737_v19, %v3172_v42 }
 0x1b2   :  { %v3800_v56 = vmul.f32 %v3737_v19, %v3204_v38  ;;  %v3804_v35 = vmul.f32 %v3737_v19, %v3153_v6  ;;  %v3808_v7 = vmul.f32 %v3737_v19, %v3188_v47  ;;  %v737_v37 = vadd.f32 %v3792_v44, %v3491_v34 }
 0x1b3   :  { %4509 = vst [vmem:[#allocation44_spill] sm:$0xff] %v3790_v39  ;;  %4510 = vst [vmem:[#allocation24_spill] sm:$0xff] %v3796_v55  ;;  %v739_v3 = vadd.f32 %v3792_v44, %v3494_v54  ;;  %v736_v42 = vadd.f32 %v3792_v44, %v3497_v23  ;;  %v738_v38 = vadd.f32 %v3792_v44, %v3500_v0 }
 0x1b4   :  { %4511 = vst [vmem:[#allocation54_spill] sm:$0xff] %v3800_v56  ;;  %4512 = vst [vmem:[#allocation60_spill] sm:$0xff] %v3804_v35  ;;  %v3820_v6 = vadd.f32 %v3792_v44, %v3515_v45  ;;  %v3824_v47 = vadd.f32 %v3792_v44, %v3521_v53  ;;  %v3828_v34 = vadd.f32 %v3792_v44, %v3528_v57  ;;  %v801_v23 = vmul.f32 0.1, %v737_v37 }
 0x1b5   :  { %4513 = vst [vmem:[#allocation61_spill] sm:$0xff] %v3808_v7  ;;  %v3832_v54 = vadd.f32 %v3792_v44, %v3534_v27  ;;  %v803_v19 = vmul.f32 0.1, %v739_v3  ;;  %v800_v58 = vmul.f32 0.1, %v736_v42  ;;  %v3836_v0 = vadd.f32 %v3792_v44, %v3541_v15  ;;  %v3838_v45 = vpop.permute.xlu1 %723 }
 0x1b6   :  { %v802_v59 = vmul.f32 0.1, %v738_v38  ;;  %v3841_v53 = vmul.f32 0.1, %v3820_v6  ;;  %v3844_v57 = vmul.f32 0.1, %v3824_v47  ;;  %v3848_v27 = vadd.f32 %v3792_v44, %v3548_v18 }
 0x1b7   :  { %v753_v7 = vadd.f32 %v3838_v45, %v3503_v26  ;;  %v865_v4 = vmax.f32 %v737_v37, %v801_v23  ;;  %v755_v15 = vadd.f32 %v3838_v45, %v3506_v5  ;;  %v867_v35 = vmax.f32 %v739_v3, %v803_v19 }
 0x1b8   :  { %v752_v12 = vadd.f32 %v3838_v45, %v3509_v28  ;;  %v864_v56 = vmax.f32 %v736_v42, %v800_v58  ;;  %v754_v62 = vadd.f32 %v3838_v45, %v3512_v52  ;;  %v866_v55 = vmax.f32 %v738_v38, %v802_v59 }
 0x1b9   :  { %v817_v24 = vmul.f32 0.1, %v753_v7  ;;  %v819_v39 = vmul.f32 0.1, %v755_v15  ;;  %v757_v18 = vadd.f32 %v3838_v45, %v3518_v8  ;;  %v869_v26 = vmax.f32 %v3820_v6, %v3841_v53  ;;  %v3862_v37 = vpop.permute.xlu1 %728 }
 0x1ba   :  { %v816_v5 = vmul.f32 0.1, %v752_v12  ;;  %v818_v3 = vmul.f32 0.1, %v754_v62  ;;  %v759_v28 = vadd.f32 %v3838_v45, %v3525_v41  ;;  %v871_v58 = vmax.f32 %v3824_v47, %v3844_v57 }
 0x1bb   :  { %v881_v52 = vmax.f32 %v753_v7, %v817_v24  ;;  %v883_v59 = vmax.f32 %v755_v15, %v819_v39  ;;  %v769_v19 = vadd.f32 %v3862_v37, %v3697_v1  ;;  %v771_v8 = vadd.f32 %v3862_v37, %v3700_v2 }
 0x1bc   :  { %v880_v42 = vmax.f32 %v752_v12, %v816_v5  ;;  %v882_v38 = vmax.f32 %v754_v62, %v818_v3  ;;  %v768_v6 = vadd.f32 %v3862_v37, %v3703_v31  ;;  %v770_v23 = vadd.f32 %v3862_v37, %v3706_v32 }
 0x1bd   :  { %v2611_v41 = vpack.c.bf16 %v881_v52, %v865_v4  ;;  %v2619_v53 = vpack.c.bf16 %v883_v59, %v867_v35  ;;  %v833_v16 = vmul.f32 0.1, %v769_v19  ;;  %v835_v47 = vmul.f32 0.1, %v771_v8  ;;  %v3876_v24 = vpop.permute.xlu1 %733 }
 0x1be   :  { %v2613_v39 = vpack.c.bf16 %v880_v42, %v864_v56  ;;  %v2621_v7 = vpack.c.bf16 %v882_v38, %v866_v55  ;;  %v832_v1 = vmul.f32 0.1, %v768_v6  ;;  %v834_v57 = vmul.f32 0.1, %v770_v23 }
 0x1bf   :  { %2612 = vmatprep.subr.bf16.mxu0 %v2611_v41  ;;  %2620 = vmatprep.subr.bf16.mxu1 %v2619_v53  ;;  %v785_v2 = vadd.f32 %v3876_v24, %v3756_v30  ;;  %v897_v62 = vmax.f32 %v769_v19, %v833_v16  ;;  %v787_v31 = vadd.f32 %v3876_v24, %v3759_v14  ;;  %v821_v32 = vmul.f32 0.1, %v757_v18 }
 0x1c0   :  { %2614 = vmatpush1.bf16.msra.mxu0 %v2613_v39  ;;  %2622 = vmatpush1.bf16.msra.mxu1 %v2621_v7  ;;  %v899_v12 = vmax.f32 %v771_v8, %v835_v47  ;;  %v784_v4 = vadd.f32 %v3876_v24, %v3762_v21  ;;  %v896_v56 = vmax.f32 %v768_v6, %v832_v1  ;;  %v823_v55 = vmul.f32 0.1, %v759_v28 }
 0x1c1   :  { %v849_v35 = vmul.f32 0.1, %v785_v2  ;;  %v851_v15 = vmul.f32 0.1, %v787_v31  ;;  %v786_v5 = vadd.f32 %v3876_v24, %v3765_v33  ;;  %v898_v30 = vmax.f32 %v770_v23, %v834_v57 }
 0x1c2   :  { %v848_v16 = vmul.f32 0.1, %v784_v4  ;;  %v885_v3 = vmax.f32 %v757_v18, %v821_v32  ;;  %v887_v52 = vmax.f32 %v759_v28, %v823_v55  ;;  %v756_v14 = vadd.f32 %v3838_v45, %v3531_v60 }
 0x1c3   :  { %v913_v59 = vmax.f32 %v785_v2, %v849_v35  ;;  %v915_v19 = vmax.f32 %v787_v31, %v851_v15  ;;  %v850_v8 = vmul.f32 0.1, %v786_v5  ;;  %v804_v21 = vmul.f32 0.1, %v3828_v34 }
 0x1c4   :  { %v912_v42 = vmax.f32 %v784_v4, %v848_v16  ;;  %v2627_v38 = vpack.c.bf16 %v885_v3, %v869_v26  ;;  %v2635_v6 = vpack.c.bf16 %v887_v52, %v871_v58  ;;  %v820_v41 = vmul.f32 0.1, %v756_v14 }
 0x1c5   :  { %v2615_v53 = vpack.c.bf16 %v913_v59, %v897_v62  ;;  %v2623_v47 = vpack.c.bf16 %v915_v19, %v899_v12  ;;  %v914_v39 = vmax.f32 %v786_v5, %v850_v8  ;;  %v868_v33 = vmax.f32 %v3828_v34, %v804_v21  ;;  %v3903_v34 = vld [vmem:[%s4296_s2] sm:$0xff] }
 0x1c6   :  { %v2617_v23 = vpack.c.bf16 %v912_v42, %v896_v56  ;;  %v884_v18 = vmax.f32 %v756_v14, %v820_v41  ;;  %v758_v28 = vadd.f32 %v3838_v45, %v3538_v11  ;;  %v806_v60 = vmul.f32 0.1, %v3832_v54 }
 0x1c7   :  { %2616 = vmatprep.subr.bf16.mxu0 %v2615_v53  ;;  %2624 = vmatprep.subr.bf16.mxu1 %v2623_v47  ;;  %v2625_v7 = vpack.c.bf16 %v914_v39, %v898_v30  ;;  %v773_v26 = vadd.f32 %v3862_v37, %v3709_v22  ;;  %v789_v58 = vadd.f32 %v3876_v24, %v3768_v50  ;;  %v3898_v1 = vmul.f32 0.1, %v3836_v0 }
 0x1c8   :  { %2618 = vmatpush1.bf16.msra.mxu0 %v2617_v23  ;;  %v2629_v11 = vpack.c.bf16 %v884_v18, %v868_v33  ;;  %v822_v57 = vmul.f32 0.1, %v758_v28  ;;  %v870_v2 = vmax.f32 %v3832_v54, %v806_v60  ;;  %v775_v62 = vadd.f32 %v3862_v37, %v3713_v20  ;;  %v4515_v33 = vld [vmem:[#allocation12_spill] sm:$0xff] }
 0x1c9   :  { %2626 = vmatpush1.bf16.msra.mxu1 %v2625_v7  ;;  %2628 = vmatprep.subr.bf16.mxu0 %v2627_v38  ;;  %v837_v22 = vmul.f32 0.1, %v773_v26  ;;  %v853_v50 = vmul.f32 0.1, %v789_v58  ;;  %v791_v31 = vadd.f32 %v3876_v24, %v3771_v40  ;;  %v772_v32 = vadd.f32 %v3862_v37, %v3716_v13  ;;  %v4516_v7 = vld [vmem:[#allocation18_spill] sm:$0xff] }
 0x1ca   :  { %2636 = vmatprep.subr.bf16.mxu1 %v2635_v6  ;;  %v886_v12 = vmax.f32 %v758_v28, %v822_v57  ;;  %v839_v4 = vmul.f32 0.1, %v775_v62  ;;  %v788_v56 = vadd.f32 %v3876_v24, %v3774_v51  ;;  %v774_v54 = vadd.f32 %v3862_v37, %v3719_v10  ;;  %v3923_v51 = vld [vmem:[%s4296_s2 + $0x8] sm:$0xff] }
 0x1cb   :  { %2579 = vmatmul.mubr.msk.f32.vlgmr.msra.gmra.mrb[0].mxu0 %vm938_vm0, %v3903_v34  ;;  %v901_v20 = vmax.f32 %v773_v26, %v837_v22  ;;  %v917_v55 = vmax.f32 %v789_v58, %v853_v50  ;;  %v855_v35 = vmul.f32 0.1, %v791_v31  ;;  %v836_v15 = vmul.f32 0.1, %v772_v32 }
 0x1cc   :  { %2581 = vmatmul.mubr.msk.f32.vlgmr.msra.gmra.mrb[0].mxu1 %vm938_vm0, %v3903_v34  ;;  %2630 = vmatpush1.bf16.msra.mxu0 %v2629_v11  ;;  %v2637_v13 = vpack.c.bf16 %v886_v12, %v870_v2  ;;  %v903_v40 = vmax.f32 %v775_v62, %v839_v4  ;;  %v852_v5 = vmul.f32 0.1, %v788_v56  ;;  %v790_v10 = vadd.f32 %v3876_v24, %v3777_v29 }
 0x1cd   :  { %v2631_v30 = vpack.c.bf16 %v917_v55, %v901_v20  ;;  %v919_v16 = vmax.f32 %v791_v31, %v855_v35  ;;  %v4514_v3 = vmov 0.0   ;;  %v900_v52 = vmax.f32 %v772_v32, %v836_v15 }
 0x1ce   :  { %1015 = vmatprep.mubr.f32.mxu0 %v4514_v3  ;;  %1092 = vmatprep.mubr.f32.mxu1 %v4514_v3  ;;  %v838_v14 = vmul.f32 0.1, %v774_v54  ;;  %v916_v59 = vmax.f32 %v788_v56, %v852_v5  ;;  %v854_v19 = vmul.f32 0.1, %v790_v10  ;;  %v761_v8 = vadd.f32 %v3838_v45, %v3545_v25  ;;  %v4518_v5 = vld [vmem:[#allocation44_spill] sm:$0xff] }
 0x1cf   :  { %2638 = vmatpush1.bf16.msra.mxu1 %v2637_v13  ;;  %v873_v21 = vmax.f32 %v3836_v0, %v3898_v1  ;;  %2632 = vmatprep.subr.bf16.mxu0 %v2631_v30  ;;  %v2639_v42 = vpack.c.bf16 %v919_v16, %v903_v40  ;;  %v763_v38 = vadd.f32 %v3838_v45, %v3552_v63  ;;  %v811_v6 = vmul.f32 0.1, %v3848_v27  ;;  %v4517_v13 = vld [vmem:[#allocation30_spill] sm:$0xff] }
 0x1d0   :  { %2580 = vmatmul.mubr.msk.f32.gmra.mrb[2].mxu0 %vm938_vm0, %v3923_v51  ;;  %v902_v29 = vmax.f32 %v774_v54, %v838_v14  ;;  %2582 = vmatmul.mubr.msk.f32.gmra.mrb[2].mxu1 %vm938_vm0, %v3923_v51  ;;  %v2633_v41 = vpack.c.bf16 %v916_v59, %v900_v52  ;;  %v918_v53 = vmax.f32 %v790_v10, %v854_v19  ;;  %v825_v25 = vmul.f32 0.1, %v761_v8 }
 0x1d1   :  { %1163 = vmatprep.mubr.f32.mxu0 %v4514_v3  ;;  %v744_v0 = vadd.f32 %v3792_v44, %v3555_v43  ;;  %2640 = vmatprep.subr.bf16.mxu1 %v2639_v42  ;;  %v827_v47 = vmul.f32 0.1, %v763_v38  ;;  %v875_v39 = vmax.f32 %v3848_v27, %v811_v6  ;;  %v760_v63 = vadd.f32 %v3838_v45, %v3559_v49  ;;  %v4520_v42 = vld [vmem:[#allocation13_spill] sm:$0xff] }
 0x1d2   :  { %1240 = vmatprep.mubr.f32.mxu1 %v4514_v3  ;;  %v746_v23 = vadd.f32 %v3792_v44, %v4515_v33  ;;  %2634 = vmatpush1.bf16.msra.mxu0 %v2633_v41  ;;  %v2641_v18 = vpack.c.bf16 %v918_v53, %v902_v29  ;;  %v889_v28 = vmax.f32 %v761_v8, %v825_v25  ;;  %v4519_v8 = vld [vmem:[#allocation8_spill] sm:$0xff] }
 0x1d3   :  { %v808_v60 = vmul.f32 0.1, %v744_v0  ;;  %v762_v26 = vadd.f32 %v3838_v45, %v4516_v7  ;;  %v891_v43 = vmax.f32 %v763_v38, %v827_v47  ;;  %v824_v58 = vmul.f32 0.1, %v760_v63  ;;  %v4521_v38 = vld [vmem:[#allocation26_spill] sm:$0xff] }
 0x1d4   :  { %v810_v1 = vmul.f32 0.1, %v746_v23  ;;  %v777_v27 = vadd.f32 %v3862_v37, %v3723_v9  ;;  %2642 = vmatpush1.bf16.msra.mxu1 %v2641_v18  ;;  %v2643_v11 = vpack.c.bf16 %v889_v28, %v873_v21  ;;  %v793_v2 = vadd.f32 %v3876_v24, %v3780_v46 }
 0x1d5   :  { %v872_v57 = vmax.f32 %v744_v0, %v808_v60  ;;  %v826_v49 = vmul.f32 0.1, %v762_v26  ;;  %v2651_v62 = vpack.c.bf16 %v891_v43, %v875_v39  ;;  %2583 = vmatmul.mubr.msk.f32.vlgmr.msra.gmra.mrb[4].mxu0 %vm938_vm0, %v3903_v34  ;;  %v888_v22 = vmax.f32 %v760_v63, %v824_v58  ;;  %v4522_v0 = vld [vmem:[#allocation9_spill] sm:$0xff] }
 0x1d6   :  { %v874_v50 = vmax.f32 %v746_v23, %v810_v1  ;;  %v841_v31 = vmul.f32 0.1, %v777_v27  ;;  %2644 = vmatprep.subr.bf16.mxu0 %v2643_v11  ;;  %v857_v12 = vmul.f32 0.1, %v793_v2  ;;  %v779_v9 = vadd.f32 %v3862_v37, %v3727_v61  ;;  %1169 = vmatprep.mubr.f32.mxu0 %v4514_v3  ;;  %v4523_v23 = vld [vmem:[#allocation17_spill] sm:$0xff] }
 0x1d7   :  { %v890_v32 = vmax.f32 %v762_v26, %v826_v49  ;;  %v795_v4 = vadd.f32 %v3876_v24, %v3784_v36  ;;  %2652 = vmatprep.subr.bf16.mxu1 %v2651_v62  ;;  %2585 = vmatmul.mubr.msk.f32.vlgmr.msra.gmra.mrb[4].mxu1 %vm938_vm0, %v3903_v34  ;;  %v2645_v46 = vpack.c.bf16 %v888_v22, %v872_v57  ;;  %v4524_v26 = vld [vmem:[#allocation29_spill] sm:$0xff]  ;;  %v4526_v22 = vld [vmem:[#allocation22_spill] sm:$0xff] }
 0x1d8   :  { %v905_v56 = vmax.f32 %v777_v27, %v841_v31  ;;  %v776_v54 = vadd.f32 %v3862_v37, %v3731_v17  ;;  %v921_v55 = vmax.f32 %v793_v2, %v857_v12  ;;  %v843_v35 = vmul.f32 0.1, %v779_v9  ;;  %1246 = vmatprep.mubr.f32.mxu1 %v4514_v3  ;;  %v4525_v2 = vld [vmem:[#allocation20_spill] sm:$0xff]  ;;  %v4527_v12 = vld [vmem:[#allocation25_spill] sm:$0xff] }
 0x1d9   :  { %v2653_v20 = vpack.c.bf16 %v890_v32, %v874_v50  ;;  %v859_v15 = vmul.f32 0.1, %v795_v4  ;;  %2646 = vmatpush1.bf16.msra.mxu0 %v2645_v46  ;;  %v792_v61 = vadd.f32 %v3876_v24, %v3787_v48  ;;  %v778_v40 = vadd.f32 %v3862_v37, %v4517_v13  ;;  %v4530_v13 = vld [vmem:[#allocation54_spill] sm:$0xff] }
 0x1da   :  { %v840_v36 = vmul.f32 0.1, %v776_v54  ;;  %v794_v10 = vadd.f32 %v3876_v24, %v4518_v5  ;;  %v2647_v30 = vpack.c.bf16 %v921_v55, %v905_v56  ;;  %v907_v17 = vmax.f32 %v779_v9, %v843_v35  ;;  %2584 = vmatmul.mubr.msk.f32.gmra.mrb[6].mxu0 %vm938_vm0, %v3923_v51 }
 0x1db   :  { %2654 = vmatpush1.bf16.msra.mxu1 %v2653_v20  ;;  %v923_v16 = vmax.f32 %v795_v4, %v859_v15  ;;  %v856_v52 = vmul.f32 0.1, %v792_v61  ;;  %v842_v48 = vmul.f32 0.1, %v778_v40  ;;  %1317 = vmatprep.mubr.f32.mxu0 %v4514_v3  ;;  %v749_v21 = vadd.f32 %v3792_v44, %v4519_v8  ;;  %v4528_v4 = vld [vmem:[#allocation24_spill] sm:$0xff] }
 0x1dc   :  { %2586 = vmatmul.mubr.msk.f32.gmra.mrb[6].mxu1 %vm938_vm0, %v3923_v51  ;;  %v904_v14 = vmax.f32 %v776_v54, %v840_v36  ;;  %v858_v59 = vmul.f32 0.1, %v794_v10  ;;  %2648 = vmatprep.subr.bf16.mxu0 %v2647_v30  ;;  %v765_v29 = vadd.f32 %v3838_v45, %v4520_v42  ;;  %v751_v6 = vadd.f32 %v3792_v44, %v4521_v38  ;;  %v4532_v8 = vld [vmem:[#allocation60_spill] sm:$0xff] }
 0x1dd   :  { %v2655_v19 = vpack.c.bf16 %v923_v16, %v907_v17  ;;  %v920_v41 = vmax.f32 %v792_v61, %v856_v52  ;;  %v906_v53 = vmax.f32 %v778_v40, %v842_v48  ;;  %v767_v47 = vadd.f32 %v3838_v45, %v4522_v0  ;;  %1394 = vmatprep.mubr.f32.mxu1 %v4514_v3  ;;  %v4529_v61 = vld [vmem:[#allocation31_spill] sm:$0xff]  ;;  %v4533_v42 = vld [vmem:[#allocation56_spill] sm:$0xff] }
 0x1de   :  { %v922_v25 = vmax.f32 %v794_v10, %v858_v59  ;;  %v813_v39 = vmul.f32 0.1, %v749_v21  ;;  %v829_v63 = vmul.f32 0.1, %v765_v29  ;;  %v815_v33 = vmul.f32 0.1, %v751_v6 }
 0x1df   :  { %2656 = vmatprep.subr.bf16.mxu1 %v2655_v19  ;;  %v748_v18 = vadd.f32 %v3792_v44, %v4523_v23  ;;  %v2649_v28 = vpack.c.bf16 %v920_v41, %v904_v14  ;;  %v831_v7 = vmul.f32 0.1, %v767_v47  ;;  %v764_v43 = vadd.f32 %v3838_v45, %v4524_v26  ;;  %v4531_v59 = vld [vmem:[#allocation48_spill] sm:$0xff] }
 0x1e0   :  { %v2657_v60 = vpack.c.bf16 %v922_v25, %v906_v53  ;;  %v877_v58 = vmax.f32 %v749_v21, %v813_v39  ;;  %v893_v1 = vmax.f32 %v765_v29, %v829_v63  ;;  %v879_v27 = vmax.f32 %v751_v6, %v815_v33  ;;  %v4534_v53 = vld [vmem:[#allocation61_spill] sm:$0xff]  ;;  %v4535_v63 = vld [vmem:[#allocation10_spill] sm:$0xff] }
 0x1e1   :  { %v812_v11 = vmul.f32 0.1, %v748_v18  ;;  %2650 = vmatpush1.bf16.msra.mxu0 %v2649_v28  ;;  %v895_v57 = vmax.f32 %v767_v47, %v831_v7  ;;  %v828_v49 = vmul.f32 0.1, %v764_v43  ;;  %v750_v62 = vadd.f32 %v3792_v44, %v4525_v2  ;;  %v4536_v28 = vld [vmem:[#allocation21_spill] sm:$0xff]  ;;  %v4537_v7 = vld [vmem:[#allocation14_spill] sm:$0xff] }
 0x1e2   :  { %2658 = vmatpush1.bf16.msra.mxu1 %v2657_v60  ;;  %v766_v50 = vadd.f32 %v3838_v45, %v4526_v22  ;;  %v2659_v31 = vpack.c.bf16 %v893_v1, %v877_v58  ;;  %v781_v9 = vadd.f32 %v3862_v37, %v4527_v12  ;;  %v797_v46 = vadd.f32 %v3876_v24, %v4528_v4  ;;  %v4540_v12 = vld [vmem:[#allocation27_spill] sm:$0xff]  ;;  %v1626_v4 = vld [vmem:[#allocation2 + $0x308] sm:$0xff] }
 0x1e3   :  { %v876_v32 = vmax.f32 %v748_v18, %v812_v11  ;;  %v2667_v56 = vpack.c.bf16 %v895_v57, %v879_v27  ;;  %v892_v54 = vmax.f32 %v764_v43, %v828_v49  ;;  %v814_v20 = vmul.f32 0.1, %v750_v62  ;;  %v4538_v49 = vld [vmem:[#allocation23_spill] sm:$0xff] }
 0x1e4   :  { %v830_v55 = vmul.f32 0.1, %v766_v50  ;;  %2660 = vmatprep.subr.bf16.mxu0 %v2659_v31  ;;  %2587 = vmatmul.mubr.msk.f32.vlgmr.msra.gmra.mrb[8].mxu0 %vm938_vm0, %v3903_v34  ;;  %v845_v35 = vmul.f32 0.1, %v781_v9  ;;  %v861_v15 = vmul.f32 0.1, %v797_v46  ;;  %v783_v36 = vadd.f32 %v3862_v37, %v4529_v61 }
 0x1e5   :  { %v799_v40 = vadd.f32 %v3876_v24, %v4530_v13  ;;  %2668 = vmatprep.subr.bf16.mxu1 %v2667_v56  ;;  %2589 = vmatmul.mubr.msk.f32.vlgmr.msra.gmra.mrb[8].mxu1 %vm938_vm0, %v3903_v34  ;;  %v2661_v5 = vpack.c.bf16 %v892_v54, %v876_v32  ;;  %v878_v10 = vmax.f32 %v750_v62, %v814_v20  ;;  %v4539_v31 = vld [vmem:[#allocation11_spill] sm:$0xff]  ;;  %v4542_v13 = vld [vmem:[#allocation28_spill] sm:$0xff] }
 0x1e6   :  { %v894_v30 = vmax.f32 %v766_v50, %v830_v55  ;;  %v909_v17 = vmax.f32 %v781_v9, %v845_v35  ;;  %v925_v16 = vmax.f32 %v797_v46, %v861_v15  ;;  %v847_v52 = vmul.f32 0.1, %v783_v36  ;;  %1323 = vmatprep.mubr.f32.mxu0 %v4514_v3  ;;  %1400 = vmatprep.mubr.f32.mxu1 %v4514_v3  ;;  %v1642_v46 = vld [vmem:[#allocation2 + $0x388] sm:$0xff]  ;;  %v4541_v61 = vld [vmem:[#allocation39_spill] sm:$0xff] }
 0x1e7   :  { %v863_v14 = vmul.f32 0.1, %v799_v40  ;;  %2662 = vmatpush1.bf16.msra.mxu0 %v2661_v5  ;;  %v780_v19 = vadd.f32 %v3862_v37, %v4531_v59  ;;  %v796_v21 = vadd.f32 %v3876_v24, %v4532_v8  ;;  %v782_v29 = vadd.f32 %v3862_v37, %v4533_v42  ;;  %v1625_v42 = vld [vmem:[#allocation2 + $0x300] sm:$0xff] }
 0x1e8   :  { %v2669_v48 = vpack.c.bf16 %v894_v30, %v878_v10  ;;  %v2663_v38 = vpack.c.bf16 %v925_v16, %v909_v17  ;;  %v911_v6 = vmax.f32 %v783_v36, %v847_v52  ;;  %2588 = vmatmul.mubr.msk.f32.gmra.mrb[10].mxu0 %vm938_vm0, %v3923_v51  ;;  %v798_v25 = vadd.f32 %v3876_v24, %v4534_v53  ;;  %v4543_v30 = vld [vmem:[#allocation55_spill] sm:$0xff]  ;;  %v4544_v16 = vld [vmem:[#allocation40_spill] sm:$0xff] }
 0x1e9   :  { %v927_v41 = vmax.f32 %v799_v40, %v863_v14  ;;  %v844_v0 = vmul.f32 0.1, %v780_v19  ;;  %v860_v47 = vmul.f32 0.1, %v796_v21  ;;  %v846_v39 = vmul.f32 0.1, %v782_v29  ;;  %1471 = vmatprep.mubr.f32.mxu0 %v4514_v3  ;;  %2590 = vmatmul.mubr.msk.f32.gmra.mrb[10].mxu1 %vm938_vm0, %v3923_v51 }
 0x1ea   :  { %2670 = vmatpush1.bf16.msra.mxu1 %v2669_v48  ;;  %v1722_v33 = vadd.f32 %v4535_v63, %v3792_v44  ;;  %2664 = vmatprep.subr.bf16.mxu0 %v2663_v38  ;;  %v862_v18 = vmul.f32 0.1, %v798_v25  ;;  %v1738_v60 = vadd.f32 %v4536_v28, %v3838_v45  ;;  %v1724_v26 = vadd.f32 %v4537_v7, %v3792_v44  ;;  %v1628_v14 = vld [vmem:[#allocation2 + $0x318] sm:$0xff]  ;;  %v1643_v28 = vld [vmem:[#allocation2 + $0x390] sm:$0xff] }
 0x1eb   :  { %v2671_v23 = vpack.c.bf16 %v927_v41, %v911_v6  ;;  %v908_v43 = vmax.f32 %v780_v19, %v844_v0  ;;  %v924_v58 = vmax.f32 %v796_v21, %v860_v47  ;;  %v910_v1 = vmax.f32 %v782_v29, %v846_v39  ;;  %1548 = vmatprep.mubr.f32.mxu1 %v4514_v3  ;;  %v1644_v21 = vld [vmem:[#allocation2 + $0x398] sm:$0xff]  ;;  %v1641_v41 = vld [vmem:[#allocation2 + $0x380] sm:$0xff] }
 0x1ec   :  { %v1786_v27 = vmul.f32 0.1, %v1722_v33  ;;  %v926_v11 = vmax.f32 %v798_v25, %v862_v18  ;;  %v1802_v57 = vmul.f32 0.1, %v1738_v60  ;;  %v1740_v2 = vadd.f32 %v4538_v49, %v3838_v45  ;;  %v1627_v18 = vld [vmem:[#allocation2 + $0x310] sm:$0xff] }
 0x1ed   :  { %2672 = vmatprep.subr.bf16.mxu1 %v2671_v23  ;;  %v1788_v62 = vmul.f32 0.1, %v1724_v26  ;;  %v2665_v22 = vpack.c.bf16 %v924_v58, %v908_v43  ;;  %v1721_v32 = vadd.f32 %v4539_v31, %v3792_v44  ;;  %v1737_v9 = vadd.f32 %v4540_v12, %v3838_v45  ;;  %v4545_v31 = vld [vmem:[#allocation16_spill] sm:$0xff] }
 0x1ee   :  { %v1850_v50 = vmax.f32 %v1722_v33, %v1786_v27  ;;  %v2673_v56 = vpack.c.bf16 %v926_v11, %v910_v1  ;;  %v1866_v54 = vmax.f32 %v1738_v60, %v1802_v57  ;;  %v1804_v20 = vmul.f32 0.1, %v1740_v2 }
 0x1ef   :  { %v1852_v55 = vmax.f32 %v1724_v26, %v1788_v62  ;;  %2666 = vmatpush1.bf16.msra.mxu0 %v2665_v22  ;;  %v1785_v35 = vmul.f32 0.1, %v1721_v32  ;;  %v1801_v15 = vmul.f32 0.1, %v1737_v9  ;;  %v1723_v36 = vadd.f32 %v4541_v61, %v3792_v44 }
 0x1f0   :  { %v1739_v40 = vadd.f32 %v4542_v13, %v3838_v45  ;;  %2674 = vmatpush1.bf16.msra.mxu1 %v2673_v56  ;;  %v2675_v5 = vpack.c.bf16 %v1866_v54, %v1850_v50  ;;  %v1868_v10 = vmax.f32 %v1740_v2, %v1804_v20  ;;  %v1690_v17 = vmul.f32 %v1626_v4, %v4543_v30  ;;  %v4546_v20 = vld [vmem:[#allocation32_spill] sm:$0xff]  ;;  %v4547_v13 = vld [vmem:[#allocation33_spill] sm:$0xff] }
 0x1f1   :  { %v1706_v52 = vmul.f32 %v1642_v46, %v4544_v16  ;;  %v1849_v48 = vmax.f32 %v1721_v32, %v1785_v35  ;;  %v1865_v59 = vmax.f32 %v1737_v9, %v1801_v15  ;;  %v1787_v19 = vmul.f32 0.1, %v1723_v36 }
 0x1f2   :  { %v1803_v8 = vmul.f32 0.1, %v1739_v40  ;;  %2676 = vmatprep.subr.bf16.mxu0 %v2675_v5  ;;  %v2683_v29 = vpack.c.bf16 %v1868_v10, %v1852_v55  ;;  %2591 = vmatmul.mubr.msk.f32.vlgmr.msra.gmra.mrb[12].mxu0 %vm938_vm0, %v3903_v34  ;;  %v1754_v38 = vadd.f32 %v1690_v17, %v3862_v37  ;;  %v1692_v47 = vmul.f32 %v1628_v14, %v4543_v30 }
 0x1f3   :  { %v1770_v6 = vadd.f32 %v1706_v52, %v3876_v24  ;;  %2593 = vmatmul.mubr.msk.f32.vlgmr.msra.gmra.mrb[12].mxu1 %vm938_vm0, %v3903_v34  ;;  %v2677_v53 = vpack.c.bf16 %v1865_v59, %v1849_v48  ;;  %v1851_v25 = vmax.f32 %v1723_v36, %v1787_v19  ;;  %v1708_v33 = vmul.f32 %v1644_v21, %v4544_v16  ;;  %v4548_v52 = vld [vmem:[#allocation37_spill] sm:$0xff] }
 0x1f4   :  { %v1867_v0 = vmax.f32 %v1739_v40, %v1803_v8  ;;  %2684 = vmatprep.subr.bf16.mxu1 %v2683_v29  ;;  %v1818_v39 = vmul.f32 0.1, %v1754_v38  ;;  %1477 = vmatprep.mubr.f32.mxu0 %v4514_v3  ;;  %v1689_v23 = vmul.f32 %v1625_v42, %v4543_v30  ;;  %v1756_v7 = vadd.f32 %v1692_v47, %v3862_v37  ;;  %v4549_v29 = vld [vmem:[#allocation38_spill] sm:$0xff] }
 0x1f5   :  { %v1834_v63 = vmul.f32 0.1, %v1770_v6  ;;  %2678 = vmatpush1.bf16.msra.mxu0 %v2677_v53  ;;  %1554 = vmatprep.mubr.f32.mxu1 %v4514_v3  ;;  %v1705_v26 = vmul.f32 %v1641_v41, %v4544_v16  ;;  %v1772_v1 = vadd.f32 %v1708_v33, %v3876_v24  ;;  %v1691_v49 = vmul.f32 %v1627_v18, %v4543_v30  ;;  %v1630_v53 = vld [vmem:[#allocation2 + $0x328] sm:$0xff]  ;;  %v4552_v33 = vld [vmem:[#allocation42_spill] sm:$0xff] }
 0x1f6   :  { %v2685_v60 = vpack.c.bf16 %v1867_v0, %v1851_v25  ;;  %v1882_v43 = vmax.f32 %v1754_v38, %v1818_v39  ;;  %2592 = vmatmul.mubr.msk.f32.gmra.mrb[14].mxu0 %vm938_vm0, %v3923_v51  ;;  %v1753_v27 = vadd.f32 %v1689_v23, %v3862_v37  ;;  %v1820_v11 = vmul.f32 0.1, %v1756_v7  ;;  %v1646_v25 = vld [vmem:[#allocation2 + $0x3a8] sm:$0xff]  ;;  %v4551_v39 = vld [vmem:[#allocation35_spill] sm:$0xff] }
 0x1f7   :  { %v1898_v58 = vmax.f32 %v1770_v6, %v1834_v63  ;;  %v1769_v57 = vadd.f32 %v1705_v26, %v3876_v24  ;;  %v1707_v2 = vmul.f32 %v1643_v28, %v4544_v16  ;;  %1977 = vmatprep.mubr.f32.mxu0 %v4514_v3  ;;  %v1836_v22 = vmul.f32 0.1, %v1772_v1  ;;  %2594 = vmatmul.mubr.msk.f32.gmra.mrb[14].mxu1 %vm938_vm0, %v3923_v51  ;;  %v4550_v6 = vld [vmem:[#allocation34_spill] sm:$0xff] }
 0x1f8   :  { %2686 = vmatpush1.bf16.msra.mxu1 %v2685_v60  ;;  %v1817_v50 = vmul.f32 0.1, %v1753_v27  ;;  %v1726_v32 = vadd.f32 %v4545_v31, %v3792_v44  ;;  %v1884_v12 = vmax.f32 %v1756_v7, %v1820_v11  ;;  %v1755_v4 = vadd.f32 %v1691_v49, %v3862_v37  ;;  %2054 = vmatprep.mubr.f32.mxu1 %v4514_v3  ;;  %v1648_v11 = vld [vmem:[#allocation2 + $0x3b8] sm:$0xff] }
 0x1f9   :  { %v2679_v62 = vpack.c.bf16 %v1898_v58, %v1882_v43  ;;  %v1833_v9 = vmul.f32 0.1, %v1769_v57  ;;  %v1771_v46 = vadd.f32 %v1707_v2, %v3876_v24  ;;  %v1900_v56 = vmax.f32 %v1772_v1, %v1836_v22 }
 0x1fa   :  { %v1881_v54 = vmax.f32 %v1753_v27, %v1817_v50  ;;  %v1742_v55 = vadd.f32 %v4546_v20, %v3838_v45  ;;  %v1790_v35 = vmul.f32 0.1, %v1726_v32  ;;  %v1819_v61 = vmul.f32 0.1, %v1755_v4  ;;  %v1632_v27 = vld [vmem:[#allocation2 + $0x338] sm:$0xff] }
 0x1fb   :  { %2680 = vmatprep.subr.bf16.mxu0 %v2679_v62  ;;  %v1897_v15 = vmax.f32 %v1769_v57, %v1833_v9  ;;  %v1835_v36 = vmul.f32 0.1, %v1771_v46  ;;  %v1728_v40 = vadd.f32 %v4547_v13, %v3792_v44  ;;  %v2687_v5 = vpack.c.bf16 %v1900_v56, %v1884_v12  ;;  %v1629_v62 = vld [vmem:[#allocation2 + $0x320] sm:$0xff]  ;;  %v1631_v9 = vld [vmem:[#allocation2 + $0x330] sm:$0xff] }
 0x1fc   :  { %v1806_v10 = vmul.f32 0.1, %v1742_v55  ;;  %v1854_v17 = vmax.f32 %v1726_v32, %v1790_v35  ;;  %v1744_v14 = vadd.f32 %v4548_v52, %v3838_v45  ;;  %v1883_v59 = vmax.f32 %v1755_v4, %v1819_v61  ;;  %v1645_v12 = vld [vmem:[#allocation2 + $0x3a0] sm:$0xff] }
 0x1fd   :  { %v2681_v48 = vpack.c.bf16 %v1897_v15, %v1881_v54  ;;  %v1899_v19 = vmax.f32 %v1771_v46, %v1835_v36  ;;  %v1792_v8 = vmul.f32 0.1, %v1728_v40  ;;  %2688 = vmatprep.subr.bf16.mxu1 %v2687_v5  ;;  %v1725_v38 = vadd.f32 %v4549_v29, %v3792_v44  ;;  %v1647_v15 = vld [vmem:[#allocation2 + $0x3b0] sm:$0xff] }
 0x1fe   :  { %v1870_v21 = vmax.f32 %v1742_v55, %v1806_v10  ;;  %v1808_v42 = vmul.f32 0.1, %v1744_v14  ;;  %v1741_v41 = vadd.f32 %v4550_v6, %v3838_v45  ;;  %v1727_v63 = vadd.f32 %v4551_v39, %v3792_v44 }
 0x1ff   :  { %2682 = vmatpush1.bf16.msra.mxu0 %v2681_v48  ;;  %v2689_v0 = vpack.c.bf16 %v1899_v19, %v1883_v59  ;;  %v1856_v47 = vmax.f32 %v1728_v40, %v1792_v8  ;;  %v1743_v23 = vadd.f32 %v4552_v33, %v3838_v45  ;;  %v1789_v60 = vmul.f32 0.1, %v1725_v38 }
 0x200   :  { %v2691_v18 = vpack.c.bf16 %v1870_v21, %v1854_v17  ;;  %v1872_v28 = vmax.f32 %v1744_v14, %v1808_v42  ;;  %v1805_v7 = vmul.f32 0.1, %v1741_v41  ;;  %v1791_v26 = vmul.f32 0.1, %v1727_v63  ;;  %v4553_v42 = vld [vmem:[#allocation43_spill] sm:$0xff] }
 0x201   :  { %2690 = vmatpush1.bf16.msra.mxu1 %v2689_v0  ;;  %v1807_v43 = vmul.f32 0.1, %v1743_v23  ;;  %v1694_v58 = vmul.f32 %v1630_v53, %v4543_v30  ;;  %v1710_v1 = vmul.f32 %v1646_v25, %v4544_v16  ;;  %v1853_v49 = vmax.f32 %v1725_v38, %v1789_v60 }
 0x202   :  { %2692 = vmatprep.subr.bf16.mxu0 %v2691_v18  ;;  %v2699_v57 = vpack.c.bf16 %v1872_v28, %v1856_v47  ;;  %2595 = vmatmul.mubr.msk.f32.vlgmr.msra.gmra.mrb[16].mxu0 %vm938_vm0, %v3903_v34  ;;  %v1869_v2 = vmax.f32 %v1741_v41, %v1805_v7  ;;  %v1855_v22 = vmax.f32 %v1727_v63, %v1791_v26  ;;  %v4554_v47 = vld [vmem:[#allocation36_spill] sm:$0xff]  ;;  %v4555_v28 = vld [vmem:[#allocation41_spill] sm:$0xff] }
 0x203   :  { %v1871_v50 = vmax.f32 %v1743_v23, %v1807_v43  ;;  %v1758_v31 = vadd.f32 %v1694_v58, %v3862_v37  ;;  %v1774_v32 = vadd.f32 %v1710_v1, %v3876_v24  ;;  %1983 = vmatprep.mubr.f32.mxu0 %v4514_v3  ;;  %v1696_v46 = vmul.f32 %v1632_v27, %v4543_v30  ;;  %v4556_v58 = vld [vmem:[#allocation51_spill] sm:$0xff] }
 0x204   :  { %2700 = vmatprep.subr.bf16.mxu1 %v2699_v57  ;;  %2597 = vmatmul.mubr.msk.f32.vlgmr.msra.gmra.mrb[16].mxu1 %vm938_vm0, %v3903_v34  ;;  %v2693_v4 = vpack.c.bf16 %v1869_v2, %v1853_v49  ;;  %v1712_v56 = vmul.f32 %v1648_v11, %v4544_v16  ;;  %v1693_v35 = vmul.f32 %v1629_v62, %v4543_v30  ;;  %v4557_v49 = vld [vmem:[#allocation52_spill] sm:$0xff] }
 0x205   :  { %v2701_v54 = vpack.c.bf16 %v1871_v50, %v1855_v22  ;;  %v1822_v20 = vmul.f32 0.1, %v1758_v31  ;;  %v1838_v55 = vmul.f32 0.1, %v1774_v32  ;;  %2060 = vmatprep.mubr.f32.mxu1 %v4514_v3  ;;  %v1760_v61 = vadd.f32 %v1696_v46, %v3862_v37  ;;  %v4558_v50 = vld [vmem:[#allocation45_spill] sm:$0xff] }
 0x206   :  { %2694 = vmatpush1.bf16.msra.mxu0 %v2693_v4  ;;  %v1776_v36 = vadd.f32 %v1712_v56, %v3876_v24  ;;  %v1709_v13 = vmul.f32 %v1645_v12, %v4544_v16  ;;  %v1695_v40 = vmul.f32 %v1631_v9, %v4543_v30  ;;  %v1757_v17 = vadd.f32 %v1693_v35, %v3862_v37  ;;  %v1634_v9 = vld [vmem:[#allocation2 + $0x348] sm:$0xff] }
 0x207   :  { %2702 = vmatpush1.bf16.msra.mxu1 %v2701_v54  ;;  %v1886_v5 = vmax.f32 %v1758_v31, %v1822_v20  ;;  %v1902_v10 = vmax.f32 %v1774_v32, %v1838_v55  ;;  %2596 = vmatmul.mubr.msk.f32.gmra.mrb[18].mxu0 %vm938_vm0, %v3923_v51  ;;  %v1824_v52 = vmul.f32 0.1, %v1760_v61  ;;  %v1711_v59 = vmul.f32 %v1647_v15, %v4544_v16  ;;  %v4559_v32 = vld [vmem:[#allocation46_spill] sm:$0xff]  ;;  %v1650_v4 = vld [vmem:[#allocation2 + $0x3c8] sm:$0xff]  ;;  %v4560_v20 = vld [vmem:[#allocation47_spill] sm:$0xff] }
 0x208   :  { %v1840_v14 = vmul.f32 0.1, %v1776_v36  ;;  %2598 = vmatmul.mubr.msk.f32.gmra.mrb[18].mxu1 %vm938_vm0, %v3923_v51  ;;  %v1773_v48 = vadd.f32 %v1709_v13, %v3876_v24  ;;  %2131 = vmatprep.mubr.f32.mxu0 %v4514_v3  ;;  %v1821_v8 = vmul.f32 0.1, %v1757_v17  ;;  %v1759_v21 = vadd.f32 %v1695_v40, %v3862_v37  ;;  %v1636_v13 = vld [vmem:[#allocation2 + $0x358] sm:$0xff] }
 0x209   :  { %v2695_v19 = vpack.c.bf16 %v1902_v10, %v1886_v5  ;;  %v1730_v29 = vadd.f32 %v4553_v42, %v3792_v44  ;;  %2208 = vmatprep.mubr.f32.mxu1 %v4514_v3  ;;  %v1888_v38 = vmax.f32 %v1760_v61, %v1824_v52  ;;  %v1775_v53 = vadd.f32 %v1711_v59, %v3876_v24  ;;  %v1652_v52 = vld [vmem:[#allocation2 + $0x3d8] sm:$0xff] }
 0x20a   :  { %v1904_v6 = vmax.f32 %v1776_v36, %v1840_v14  ;;  %v1837_v41 = vmul.f32 0.1, %v1773_v48  ;;  %v1885_v25 = vmax.f32 %v1757_v17, %v1821_v8  ;;  %v1823_v0 = vmul.f32 0.1, %v1759_v21  ;;  %v1633_v14 = vld [vmem:[#allocation2 + $0x340] sm:$0xff] }
 0x20b   :  { %2696 = vmatprep.subr.bf16.mxu0 %v2695_v19  ;;  %v1746_v39 = vadd.f32 %v4554_v47, %v3838_v45  ;;  %v1794_v63 = vmul.f32 0.1, %v1730_v29  ;;  %v1839_v18 = vmul.f32 0.1, %v1775_v53  ;;  %v1732_v60 = vadd.f32 %v4555_v28, %v3792_v44 }
 0x20c   :  { %v2703_v33 = vpack.c.bf16 %v1904_v6, %v1888_v38  ;;  %v1901_v23 = vmax.f32 %v1773_v48, %v1837_v41  ;;  %v1887_v7 = vmax.f32 %v1759_v21, %v1823_v0  ;;  %v1748_v1 = vadd.f32 %v4556_v58, %v3838_v45  ;;  %v1649_v38 = vld [vmem:[#allocation2 + $0x3c0] sm:$0xff]  ;;  %v1635_v6 = vld [vmem:[#allocation2 + $0x350] sm:$0xff] }
 0x20d   :  { %v1810_v26 = vmul.f32 0.1, %v1746_v39  ;;  %v1858_v43 = vmax.f32 %v1730_v29, %v1794_v63  ;;  %v1903_v11 = vmax.f32 %v1775_v53, %v1839_v18  ;;  %v1796_v57 = vmul.f32 0.1, %v1732_v60  ;;  %v1651_v0 = vld [vmem:[#allocation2 + $0x3d0] sm:$0xff] }
 0x20e   :  { %2704 = vmatprep.subr.bf16.mxu1 %v2703_v33  ;;  %v2697_v27 = vpack.c.bf16 %v1901_v23, %v1885_v25  ;;  %v1729_v2 = vadd.f32 %v4557_v49, %v3792_v44  ;;  %v1812_v22 = vmul.f32 0.1, %v1748_v1  ;;  %v1745_v31 = vadd.f32 %v4558_v50, %v3838_v45 }
 0x20f   :  { %v1874_v62 = vmax.f32 %v1746_v39, %v1810_v26  ;;  %v1731_v12 = vadd.f32 %v4559_v32, %v3792_v44  ;;  %v2705_v46 = vpack.c.bf16 %v1903_v11, %v1887_v7  ;;  %v1860_v56 = vmax.f32 %v1732_v60, %v1796_v57 }
 0x210   :  { %2698 = vmatpush1.bf16.msra.mxu0 %v2697_v27  ;;  %v1793_v54 = vmul.f32 0.1, %v1729_v2  ;;  %v1747_v55 = vadd.f32 %v4560_v20, %v3838_v45  ;;  %v1876_v15 = vmax.f32 %v1748_v1, %v1812_v22  ;;  %v1809_v61 = vmul.f32 0.1, %v1745_v31  ;;  %v4561_v22 = vld [vmem:[#allocation49_spill] sm:$0xff] }
 0x211   :  { %v2707_v35 = vpack.c.bf16 %v1874_v62, %v1858_v43  ;;  %v1795_v36 = vmul.f32 0.1, %v1731_v12  ;;  %2706 = vmatpush1.bf16.msra.mxu1 %v2705_v46  ;;  %v1698_v10 = vmul.f32 %v1634_v9, %v4543_v30  ;;  %v1714_v17 = vmul.f32 %v1650_v4, %v4544_v16  ;;  %v4562_v46 = vld [vmem:[#allocation50_spill] sm:$0xff]  ;;  %v4563_v20 = vld [vmem:[#allocation53_spill] sm:$0xff] }
 0x212   :  { %v1857_v40 = vmax.f32 %v1729_v2, %v1793_v54  ;;  %v1811_v5 = vmul.f32 0.1, %v1747_v55  ;;  %v2715_v48 = vpack.c.bf16 %v1876_v15, %v1860_v56  ;;  %v1873_v59 = vmax.f32 %v1745_v31, %v1809_v61 }
 0x213   :  { %2708 = vmatprep.subr.bf16.mxu0 %v2707_v35  ;;  %2599 = vmatmul.mubr.msk.f32.vlgmr.msra.gmra.mrb[20].mxu0 %vm938_vm0, %v3903_v34  ;;  %v1859_v19 = vmax.f32 %v1731_v12, %v1795_v36  ;;  %v1762_v21 = vadd.f32 %v1698_v10, %v3862_v37  ;;  %v1778_v42 = vadd.f32 %v1714_v17, %v3876_v24  ;;  %v4564_v36 = vld [vmem:[#allocation57_spill] sm:$0xff] }
 0x214   :  { %v1875_v8 = vmax.f32 %v1747_v55, %v1811_v5  ;;  %v1700_v29 = vmul.f32 %v1636_v13, %v4543_v30  ;;  %2137 = vmatprep.mubr.f32.mxu0 %v4514_v3  ;;  %2716 = vmatprep.subr.bf16.mxu1 %v2715_v48  ;;  %v2709_v41 = vpack.c.bf16 %v1873_v59, %v1857_v40  ;;  %v4565_v48 = vld [vmem:[#allocation58_spill] sm:$0xff] }
 0x215   :  { %2601 = vmatmul.mubr.msk.f32.vlgmr.msra.gmra.mrb[20].mxu1 %vm938_vm0, %v3903_v34  ;;  %v1716_v53 = vmul.f32 %v1652_v52, %v4544_v16  ;;  %v1697_v25 = vmul.f32 %v1633_v14, %v4543_v30  ;;  %v1826_v39 = vmul.f32 0.1, %v1762_v21  ;;  %v1842_v63 = vmul.f32 0.1, %v1778_v42 }
 0x216   :  { %v2717_v47 = vpack.c.bf16 %v1875_v8, %v1859_v19  ;;  %v1764_v33 = vadd.f32 %v1700_v29, %v3862_v37  ;;  %2214 = vmatprep.mubr.f32.mxu1 %v4514_v3  ;;  %2710 = vmatpush1.bf16.msra.mxu0 %v2709_v41  ;;  %v1713_v18 = vmul.f32 %v1649_v38, %v4544_v16  ;;  %v4566_v19 = vld [vmem:[#allocation59_spill] sm:$0xff] }
 0x217   :  { %v1780_v23 = vadd.f32 %v1716_v53, %v3876_v24  ;;  %v1761_v28 = vadd.f32 %v1697_v25, %v3862_v37  ;;  %v1699_v60 = vmul.f32 %v1635_v6, %v4543_v30  ;;  %v1890_v7 = vmax.f32 %v1762_v21, %v1826_v39  ;;  %2600 = vmatmul.mubr.msk.f32.gmra.mrb[22].mxu0 %vm938_vm0, %v3923_v51  ;;  %v1638_v21 = vld [vmem:[#allocation2 + $0x368] sm:$0xff]  ;;  %v4567_v41 = vld [vmem:[#allocation19_spill] sm:$0xff] }
 0x218   :  { %2718 = vmatpush1.bf16.msra.mxu1 %v2717_v47  ;;  %v1906_v26 = vmax.f32 %v1778_v42, %v1842_v63  ;;  %v1828_v43 = vmul.f32 0.1, %v1764_v33  ;;  %v1715_v58 = vmul.f32 %v1651_v0, %v4544_v16  ;;  %v1777_v27 = vadd.f32 %v1713_v18, %v3876_v24  ;;  %2285 = vmatprep.mubr.f32.mxu0 %v4514_v3  ;;  %v1654_v42 = vld [vmem:[#allocation2 + $0x3e8] sm:$0xff]  ;;  %v4568_v39 = vld [vmem:[#allocation15_spill] sm:$0xff] }
 0x219   :  { %v1844_v1 = vmul.f32 0.1, %v1780_v23  ;;  %2602 = vmatmul.mubr.msk.f32.gmra.mrb[22].mxu1 %vm938_vm0, %v3923_v51  ;;  %v1825_v11 = vmul.f32 0.1, %v1761_v28  ;;  %v1763_v57 = vadd.f32 %v1699_v60, %v3862_v37  ;;  %v1734_v50 = vadd.f32 %v4561_v22, %v3792_v44  ;;  %v1640_v60 = vld [vmem:[#allocation2 + $0x378] sm:$0xff] }
 0x21a   :  { %v2711_v49 = vpack.c.bf16 %v1906_v26, %v1890_v7  ;;  %v1892_v2 = vmax.f32 %v1764_v33, %v1828_v43  ;;  %v1779_v62 = vadd.f32 %v1715_v58, %v3876_v24  ;;  %2362 = vmatprep.mubr.f32.mxu1 %v4514_v3  ;;  %v1841_v32 = vmul.f32 0.1, %v1777_v27 }
 0x21b   :  { %v1908_v31 = vmax.f32 %v1780_v23, %v1844_v1  ;;  %v1889_v12 = vmax.f32 %v1761_v28, %v1825_v11  ;;  %v1827_v9 = vmul.f32 0.1, %v1763_v57  ;;  %v1750_v56 = vadd.f32 %v4562_v46, %v3838_v45  ;;  %v1637_v1 = vld [vmem:[#allocation2 + $0x360] sm:$0xff] }
 0x21c   :  { %2712 = vmatprep.subr.bf16.mxu0 %v2711_v49  ;;  %v1843_v4 = vmul.f32 0.1, %v1779_v62  ;;  %v1798_v54 = vmul.f32 0.1, %v1734_v50  ;;  %v1736_v55 = vadd.f32 %v4563_v20, %v3792_v44  ;;  %v1905_v15 = vmax.f32 %v1777_v27, %v1841_v32  ;;  %v1639_v49 = vld [vmem:[#allocation2 + $0x370] sm:$0xff] }
 0x21d   :  { %v2719_v35 = vpack.c.bf16 %v1908_v31, %v1892_v2  ;;  %v1891_v61 = vmax.f32 %v1763_v57, %v1827_v9  ;;  %v1752_v13 = vadd.f32 %v4564_v36, %v3838_v45  ;;  %v1814_v5 = vmul.f32 0.1, %v1750_v56  ;;  %v1653_v57 = vld [vmem:[#allocation2 + $0x3e0] sm:$0xff]  ;;  %v1655_v9 = vld [vmem:[#allocation2 + $0x3f0] sm:$0xff] }
 0x21e   :  { %v1907_v40 = vmax.f32 %v1779_v62, %v1843_v4  ;;  %v1862_v10 = vmax.f32 %v1734_v50, %v1798_v54  ;;  %v1800_v17 = vmul.f32 0.1, %v1736_v55  ;;  %v2713_v52 = vpack.c.bf16 %v1905_v15, %v1889_v12 }
 0x21f   :  { %2720 = vmatprep.subr.bf16.mxu1 %v2719_v35  ;;  %v1816_v14 = vmul.f32 0.1, %v1752_v13  ;;  %v1733_v59 = vadd.f32 %v4565_v48, %v3792_v44  ;;  %v1749_v8 = vadd.f32 %v4566_v19, %v3838_v45  ;;  %v1878_v38 = vmax.f32 %v1750_v56, %v1814_v5 }
 0x220   :  { %v2721_v29 = vpack.c.bf16 %v1907_v40, %v1891_v61  ;;  %v1864_v6 = vmax.f32 %v1736_v55, %v1800_v17  ;;  %v1735_v53 = vadd.f32 %v4567_v41, %v3792_v44  ;;  %2714 = vmatpush1.bf16.msra.mxu0 %v2713_v52  ;;  %v1751_v63 = vadd.f32 %v4568_v39, %v3838_v45  ;;  %v1656_v44 = vld [vmem:[#allocation2 + $0x3f8] sm:$0xff] }
 0x221   :  { %v1880_v25 = vmax.f32 %v1752_v13, %v1816_v14  ;;  %v1797_v0 = vmul.f32 0.1, %v1733_v59  ;;  %v1813_v47 = vmul.f32 0.1, %v1749_v8  ;;  %v2723_v33 = vpack.c.bf16 %v1878_v38, %v1862_v10  ;;  %v4211_v38 = vpop.permute.xlu1 %930 }
 0x222   :  { %2722 = vmatpush1.bf16.msra.mxu1 %v2721_v29  ;;  %v1799_v23 = vmul.f32 0.1, %v1735_v53  ;;  %v1702_v18 = vmul.f32 %v1638_v21, %v4543_v30  ;;  %v1718_v28 = vmul.f32 %v1654_v42, %v4544_v16  ;;  %v1815_v58 = vmul.f32 0.1, %v1751_v63  ;;  %v2794_v29 = vld [vmem:[%s4296_s2 + $0x8] sm:$0xff] }
 0x223   :  { %v2731_v7 = vpack.c.bf16 %v1880_v25, %v1864_v6  ;;  %v1861_v26 = vmax.f32 %v1733_v59, %v1797_v0  ;;  %v1877_v43 = vmax.f32 %v1749_v8, %v1813_v47  ;;  %2724 = vmatprep.subr.bf16.mxu0 %v2723_v33  ;;  %2603 = vmatmul.mubr.msk.f32.vlgmr.msra.gmra.mrb[24].mxu0 %vm938_vm0, %v3903_v34 }
 0x224   :  { %v1863_v27 = vmax.f32 %v1735_v53, %v1799_v23  ;;  %v1766_v45 = vadd.f32 %v1702_v18, %v3862_v37  ;;  %v1782_v11 = vadd.f32 %v1718_v28, %v3876_v24  ;;  %v1879_v62 = vmax.f32 %v1751_v63, %v1815_v58  ;;  %2291 = vmatprep.mubr.f32.mxu0 %v4514_v3  ;;  %v4217_v63 = vpop.permute.xlu0 %935 }
 0x225   :  { %2732 = vmatprep.subr.bf16.mxu1 %v2731_v7  ;;  %2605 = vmatmul.mubr.msk.f32.vlgmr.msra.gmra.mrb[24].mxu1 %vm938_vm0, %v3903_v34  ;;  %v2725_v2 = vpack.c.bf16 %v1877_v43, %v1861_v26  ;;  %v1704_v22 = vmul.f32 %v1640_v60, %v4543_v30  ;;  %v1720_v32 = vmul.f32 %v1656_v44, %v4544_v16 }
 0x226   :  { %v1830_v50 = vmul.f32 0.1, %v1766_v45  ;;  %v1846_v31 = vmul.f32 0.1, %v1782_v11  ;;  %2368 = vmatprep.mubr.f32.mxu1 %v4514_v3  ;;  %v1701_v12 = vmul.f32 %v1637_v1, %v4543_v30  ;;  %v2733_v4 = vpack.c.bf16 %v1879_v62, %v1863_v27 }
 0x227   :  { %2726 = vmatpush1.bf16.msra.mxu0 %v2725_v2  ;;  %v1768_v46 = vadd.f32 %v1704_v22, %v3862_v37  ;;  %v1717_v34 = vmul.f32 %v1653_v57, %v4544_v16  ;;  %v1703_v56 = vmul.f32 %v1639_v49, %v4543_v30  ;;  %v1784_v55 = vadd.f32 %v1720_v32, %v3876_v24 }
 0x228   :  { %v1894_v54 = vmax.f32 %v1766_v45, %v1830_v50  ;;  %v1910_v20 = vmax.f32 %v1782_v11, %v1846_v31  ;;  %2604 = vmatmul.mubr.msk.f32.gmra.mrb[26].mxu0 %vm938_vm0, %v3923_v51  ;;  %v1765_v35 = vadd.f32 %v1701_v12, %v3862_v37  ;;  %2734 = vmatpush1.bf16.msra.mxu1 %v2733_v4 }
 0x229   :  { %v1832_v15 = vmul.f32 0.1, %v1768_v46  ;;  %v1781_v61 = vadd.f32 %v1717_v34, %v3876_v24  ;;  %v1719_v36 = vmul.f32 %v1655_v9, %v4544_v16  ;;  %v1767_v13 = vadd.f32 %v1703_v56, %v3862_v37  ;;  %2439 = vmatprep.mubr.f32.mxu0 %v4514_v3  ;;  %2606 = vmatmul.mubr.msk.f32.gmra.mrb[26].mxu1 %vm938_vm0, %v3923_v51 }
 0x22a   :  { %v2727_v30 = vpack.c.bf16 %v1910_v20, %v1894_v54  ;;  %v1848_v40 = vmul.f32 0.1, %v1784_v55  ;;  %v1829_v5 = vmul.f32 0.1, %v1765_v35  ;;  %2516 = vmatprep.mubr.f32.mxu1 %v4514_v3 }
 0x22b   :  { %v1845_v10 = vmul.f32 0.1, %v1781_v61  ;;  %v1783_v17 = vadd.f32 %v1719_v36, %v3876_v24  ;;  %v1831_v52 = vmul.f32 0.1, %v1767_v13  ;;  %v1896_v14 = vmax.f32 %v1768_v46, %v1832_v15  ;;  %v2793_v24 = vld [vmem:[%s4296_s2] sm:$0xff]  ;;  %s2848_s2 = smov [#allocation5]  }
 0x22c   :  { %2728 = vmatprep.subr.bf16.mxu0 %v2727_v30  ;;  %v1912_v48 = vmax.f32 %v1784_v55, %v1848_v40  ;;  %v1893_v16 = vmax.f32 %v1765_v35, %v1829_v5  ;;  %s2567_s7 = sshll.u32 %s2848_s2, 4  ;;  %s2568_s7 = int_to_ptr.vmem [resolvable:$true] %s2567_s7 }
 0x22d   :  { %v1909_v59 = vmax.f32 %v1781_v61, %v1845_v10  ;;  %v1847_v37 = vmul.f32 0.1, %v1783_v17  ;;  %v1895_v21 = vmax.f32 %v1767_v13, %v1831_v52  ;;  %s2817_s8 = scalar_lea.vmem %s2568_s7, 8192  ;;  %p2822_p9 = scmp.lt.s32.totalorder %s2568_s7, %s2568_s7 }
 0x22e   :  { %v2735_v19 = vpack.c.bf16 %v1912_v48, %v1896_v14  ;;  %p2818_p8 = scmp.ne.s32.totalorder %s2568_s7, %s2817_s8  ;;  %p2823_p10 = scmp.lt.s32.totalorder %s2817_s8, %s2817_s8 }
 0x22f   :  { %v2729_v8 = vpack.c.bf16 %v1909_v59, %v1893_v16  ;;  %v1911_v42 = vmax.f32 %v1783_v17, %v1847_v37 }
 0x230   :  { %2736 = vmatprep.subr.bf16.mxu1 %v2735_v19  ;;  %p2824_p11 = por %p2823_p10, %p2822_p9 }
 0x231   :  { %2730 = vmatpush1.bf16.msra.mxu0 %v2729_v8  ;;  %v2737_v51 = vpack.c.bf16 %v1911_v42, %v1895_v21 }
 0x232   :  { %p2825_p12 = pnand %p2824_p11, %p2818_p8 }
 0x233   :  { %2738 = vmatpush1.bf16.msra.mxu1 %v2737_v51 }
 0x234   :  { %2607 = vmatmul.mubr.msk.f32.vlgmr.msra.gmra.mrb[28].mxu0 %vm938_vm0, %v2793_v24 }
 0x235   :  { %2445 = vmatprep.mubr.f32.mxu0 %v4514_v3 }
 0x236   :  { %2609 = vmatmul.mubr.msk.f32.vlgmr.msra.gmra.mrb[28].mxu1 %vm938_vm0, %v2793_v24 }
 0x237   :  { %2522 = vmatprep.mubr.f32.mxu1 %v4514_v3 }
 0x238   :  { %2608 = vmatmul.mubr.msk.f32.gmra.mrb[30].mxu0 %vm938_vm0, %v2794_v29 }
 0x23a   :  { %2610 = vmatmul.mubr.msk.f32.gmra.mrb[30].mxu1 %vm938_vm0, %v2794_v29 }
 0x29e   :  { %v1011_v6 = vpop.f32.mrb[0].mxu0 }
 0x29f   :  { %v1012_v41 = vadd.f32 %v1011_v6, %v4211_v38  ;;  %v1088_v53 = vpop.f32.mrb[0].mxu1  ;;  %v1013_v25 = vpop.f32.mrb[1].mxu0 }
 0x2a0   :  { %v1089_v0 = vadd.f32 %v1088_v53, %v4211_v38  ;;  %v1014_v47 = vadd.f32 %v1013_v25, %v4211_v38  ;;  %v1090_v3 = vpop.f32.mrb[1].mxu1 }
 0x2a1   :  { %1561 = vst [vmem:[#allocation5] sm:$0xff] %v1012_v41  ;;  %v1091_v39 = vadd.f32 %v1090_v3, %v4211_v38 }
 0x2a2   :  { %1563 = vst [vmem:[#allocation5 + $0x10] sm:$0xff] %v1089_v0  ;;  %1562 = vst [vmem:[#allocation5 + $0x8] sm:$0xff] %v1014_v47 }
 0x2a3   :  { %v1017_v33 = vpop.f32.mrb[2].mxu0  ;;  %1564 = vst [vmem:[#allocation5 + $0x18] sm:$0xff] %v1091_v39  ;;  %v1094_v18 = vpop.f32.mrb[2].mxu1 }
 0x2a4   :  { %v1018_v23 = vadd.f32 %v1017_v33, %v4217_v63  ;;  %v1019_v28 = vpop.f32.mrb[3].mxu0  ;;  %v1095_v60 = vadd.f32 %v1094_v18, %v4217_v63  ;;  %v1096_v26 = vpop.f32.mrb[3].mxu1 }
 0x2a5   :  { %v1020_v7 = vadd.f32 %v1019_v28, %v4217_v63  ;;  %v1097_v43 = vadd.f32 %v1096_v26, %v4217_v63 }
 0x2a6   :  { %1577 = vst [vmem:[#allocation5 + $0x80] sm:$0xff] %v1018_v23  ;;  %1579 = vst [vmem:[#allocation5 + $0x90] sm:$0xff] %v1095_v60 }
 0x2a7   :  { %1578 = vst [vmem:[#allocation5 + $0x88] sm:$0xff] %v1020_v7  ;;  %1580 = vst [vmem:[#allocation5 + $0x98] sm:$0xff] %v1097_v43 }
 0x2a8   :  { %v1165_v58 = vpop.f32.mrb[4].mxu0 }
 0x2a9   :  { %v1166_v44 = vadd.f32 %v1165_v58, %v4211_v38  ;;  %v1167_v1 = vpop.f32.mrb[5].mxu0 }
 0x2aa   :  { %v1242_v27 = vpop.f32.mrb[4].mxu1  ;;  %v1168_v45 = vadd.f32 %v1167_v1, %v4211_v38 }
 0x2ab   :  { %1565 = vst [vmem:[#allocation5 + $0x20] sm:$0xff] %v1166_v44  ;;  %v1243_v11 = vadd.f32 %v1242_v27, %v4211_v38  ;;  %v1244_v57 = vpop.f32.mrb[5].mxu1 }
 0x2ac   :  { %1566 = vst [vmem:[#allocation5 + $0x28] sm:$0xff] %v1168_v45  ;;  %v1245_v49 = vadd.f32 %v1244_v57, %v4211_v38 }
 0x2ad   :  { %1567 = vst [vmem:[#allocation5 + $0x30] sm:$0xff] %v1243_v11  ;;  %v1171_v2 = vpop.f32.mrb[6].mxu0 }
 0x2ae   :  { %1568 = vst [vmem:[#allocation5 + $0x38] sm:$0xff] %v1245_v49  ;;  %v1172_v62 = vadd.f32 %v1171_v2, %v4217_v63  ;;  %v1173_v50 = vpop.f32.mrb[7].mxu0 }
 0x2af   :  { %v1248_v22 = vpop.f32.mrb[6].mxu1  ;;  %v1174_v32 = vadd.f32 %v1173_v50, %v4217_v63 }
 0x2b0   :  { %v1249_v31 = vadd.f32 %v1248_v22, %v4217_v63  ;;  %v1250_v12 = vpop.f32.mrb[7].mxu1  ;;  %1581 = vst [vmem:[#allocation5 + $0xa0] sm:$0xff] %v1172_v62 }
 0x2b1   :  { %v1251_v9 = vadd.f32 %v1250_v12, %v4217_v63  ;;  %1582 = vst [vmem:[#allocation5 + $0xa8] sm:$0xff] %v1174_v32 }
 0x2b2   :  { %1583 = vst [vmem:[#allocation5 + $0xb0] sm:$0xff] %v1249_v31 }
 0x2b3   :  { %1584 = vst [vmem:[#allocation5 + $0xb8] sm:$0xff] %v1251_v9 }
 0x2b7   :  { %v1319_v4 = vpop.f32.mrb[8].mxu0 }
 0x2b8   :  { %v1320_v46 = vadd.f32 %v1319_v4, %v4211_v38  ;;  %v1396_v34 = vpop.f32.mrb[8].mxu1  ;;  %v1321_v56 = vpop.f32.mrb[9].mxu0 }
 0x2b9   :  { %v1397_v54 = vadd.f32 %v1396_v34, %v4211_v38  ;;  %v1322_v20 = vadd.f32 %v1321_v56, %v4211_v38  ;;  %v1398_v55 = vpop.f32.mrb[9].mxu1 }
 0x2ba   :  { %1569 = vst [vmem:[#allocation5 + $0x40] sm:$0xff] %v1320_v46  ;;  %v1399_v35 = vadd.f32 %v1398_v55, %v4211_v38 }
 0x2bb   :  { %1571 = vst [vmem:[#allocation5 + $0x50] sm:$0xff] %v1397_v54  ;;  %1570 = vst [vmem:[#allocation5 + $0x48] sm:$0xff] %v1322_v20  ;;  %v1325_v15 = vpop.f32.mrb[10].mxu0 }
 0x2bc   :  { %1572 = vst [vmem:[#allocation5 + $0x58] sm:$0xff] %v1399_v35  ;;  %v1326_v61 = vadd.f32 %v1325_v15, %v4217_v63  ;;  %v1327_v36 = vpop.f32.mrb[11].mxu0  ;;  %v1402_v13 = vpop.f32.mrb[10].mxu1 }
 0x2bd   :  { %v1328_v30 = vadd.f32 %v1327_v36, %v4217_v63  ;;  %v1403_v40 = vadd.f32 %v1402_v13, %v4217_v63  ;;  %v1404_v5 = vpop.f32.mrb[11].mxu1 }
 0x2be   :  { %1585 = vst [vmem:[#allocation5 + $0xc0] sm:$0xff] %v1326_v61  ;;  %v1405_v10 = vadd.f32 %v1404_v5, %v4217_v63 }
 0x2bf   :  { %1586 = vst [vmem:[#allocation5 + $0xc8] sm:$0xff] %v1328_v30  ;;  %1587 = vst [vmem:[#allocation5 + $0xd0] sm:$0xff] %v1403_v40 }
 0x2c0   :  { %1588 = vst [vmem:[#allocation5 + $0xd8] sm:$0xff] %v1405_v10 }
 0x2c5   :  { %v1473_v17 = vpop.f32.mrb[12].mxu0 }
 0x2c6   :  { %v1474_v52 = vadd.f32 %v1473_v17, %v4211_v38  ;;  %v1550_v14 = vpop.f32.mrb[12].mxu1  ;;  %v1475_v48 = vpop.f32.mrb[13].mxu0 }
 0x2c7   :  { %v1551_v16 = vadd.f32 %v1550_v14, %v4211_v38  ;;  %v1476_v59 = vadd.f32 %v1475_v48, %v4211_v38  ;;  %v1552_v37 = vpop.f32.mrb[13].mxu1 }
 0x2c8   :  { %1573 = vst [vmem:[#allocation5 + $0x60] sm:$0xff] %v1474_v52  ;;  %v1553_v19 = vadd.f32 %v1552_v37, %v4211_v38 }
 0x2c9   :  { %1575 = vst [vmem:[#allocation5 + $0x70] sm:$0xff] %v1551_v16  ;;  %1574 = vst [vmem:[#allocation5 + $0x68] sm:$0xff] %v1476_v59  ;;  %v1479_v8 = vpop.f32.mrb[14].mxu0 }
 0x2ca   :  { %1576 = vst [vmem:[#allocation5 + $0x78] sm:$0xff] %v1553_v19  ;;  %v1480_v21 = vadd.f32 %v1479_v8, %v4217_v63  ;;  %v1481_v42 = vpop.f32.mrb[15].mxu0  ;;  %v1556_v51 = vpop.f32.mrb[14].mxu1 }
 0x2cb   :  { %v1482_v24 = vadd.f32 %v1481_v42, %v4217_v63  ;;  %v1557_v29 = vadd.f32 %v1556_v51, %v4217_v63  ;;  %v1558_v6 = vpop.f32.mrb[15].mxu1 }
 0x2cc   :  { %1589 = vst [vmem:[#allocation5 + $0xe0] sm:$0xff] %v1480_v21  ;;  %v1559_v41 = vadd.f32 %v1558_v6, %v4217_v63 }
 0x2cd   :  { %1590 = vst [vmem:[#allocation5 + $0xe8] sm:$0xff] %v1482_v24  ;;  %1591 = vst [vmem:[#allocation5 + $0xf0] sm:$0xff] %v1557_v29 }
 0x2ce   :  { %1592 = vst [vmem:[#allocation5 + $0xf8] sm:$0xff] %v1559_v41 }
 0x2d5   :  { %v1979_v53 = vpop.f32.mrb[16].mxu0 }
 0x2d6   :  { %v1980_v25 = vadd.f32 %v1979_v53, %v4211_v38  ;;  %v1981_v0 = vpop.f32.mrb[17].mxu0 }
 0x2d7   :  { %v2056_v47 = vpop.f32.mrb[16].mxu1  ;;  %v1982_v3 = vadd.f32 %v1981_v0, %v4211_v38 }
 0x2d8   :  { %2530 = vst [vmem:[#allocation5 + $0x100] sm:$0xff] %v1980_v25  ;;  %v2057_v39 = vadd.f32 %v2056_v47, %v4211_v38  ;;  %v2058_v33 = vpop.f32.mrb[17].mxu1 }
 0x2d9   :  { %2531 = vst [vmem:[#allocation5 + $0x108] sm:$0xff] %v1982_v3  ;;  %v2059_v23 = vadd.f32 %v2058_v33, %v4211_v38 }
 0x2da   :  { %2532 = vst [vmem:[#allocation5 + $0x110] sm:$0xff] %v2057_v39  ;;  %v1985_v18 = vpop.f32.mrb[18].mxu0 }
 0x2db   :  { %2533 = vst [vmem:[#allocation5 + $0x118] sm:$0xff] %v2059_v23  ;;  %v1986_v28 = vadd.f32 %v1985_v18, %v4217_v63  ;;  %v2062_v60 = vpop.f32.mrb[18].mxu1  ;;  %v1987_v7 = vpop.f32.mrb[19].mxu0 }
 0x2dc   :  { %v2063_v26 = vadd.f32 %v2062_v60, %v4217_v63  ;;  %v1988_v43 = vadd.f32 %v1987_v7, %v4217_v63  ;;  %v2064_v58 = vpop.f32.mrb[19].mxu1 }
 0x2dd   :  { %2546 = vst [vmem:[#allocation5 + $0x180] sm:$0xff] %v1986_v28  ;;  %v2065_v44 = vadd.f32 %v2064_v58, %v4217_v63 }
 0x2de   :  { %2548 = vst [vmem:[#allocation5 + $0x190] sm:$0xff] %v2063_v26  ;;  %2547 = vst [vmem:[#allocation5 + $0x188] sm:$0xff] %v1988_v43 }
 0x2df   :  { %2549 = vst [vmem:[#allocation5 + $0x198] sm:$0xff] %v2065_v44 }
 0x2e6   :  { %v2133_v1 = vpop.f32.mrb[20].mxu0 }
 0x2e7   :  { %v2134_v27 = vadd.f32 %v2133_v1, %v4211_v38  ;;  %v2135_v45 = vpop.f32.mrb[21].mxu0 }
 0x2e8   :  { %v2210_v11 = vpop.f32.mrb[20].mxu1  ;;  %v2136_v57 = vadd.f32 %v2135_v45, %v4211_v38 }
 0x2e9   :  { %2534 = vst [vmem:[#allocation5 + $0x120] sm:$0xff] %v2134_v27  ;;  %v2211_v49 = vadd.f32 %v2210_v11, %v4211_v38  ;;  %v2212_v2 = vpop.f32.mrb[21].mxu1 }
 0x2ea   :  { %2535 = vst [vmem:[#allocation5 + $0x128] sm:$0xff] %v2136_v57  ;;  %v2213_v62 = vadd.f32 %v2212_v2, %v4211_v38  ;;  %v2139_v22 = vpop.f32.mrb[22].mxu0 }
 0x2eb   :  { %2536 = vst [vmem:[#allocation5 + $0x130] sm:$0xff] %v2211_v49  ;;  %v2140_v50 = vadd.f32 %v2139_v22, %v4217_v63  ;;  %v2141_v32 = vpop.f32.mrb[23].mxu0 }
 0x2ec   :  { %2537 = vst [vmem:[#allocation5 + $0x138] sm:$0xff] %v2213_v62  ;;  %v2216_v31 = vpop.f32.mrb[22].mxu1  ;;  %v2142_v9 = vadd.f32 %v2141_v32, %v4217_v63 }
 0x2ed   :  { %v2217_v12 = vadd.f32 %v2216_v31, %v4217_v63  ;;  %v2218_v4 = vpop.f32.mrb[23].mxu1  ;;  %2550 = vst [vmem:[#allocation5 + $0x1a0] sm:$0xff] %v2140_v50 }
 0x2ee   :  { %v2219_v46 = vadd.f32 %v2218_v4, %v4217_v63  ;;  %2551 = vst [vmem:[#allocation5 + $0x1a8] sm:$0xff] %v2142_v9 }
 0x2ef   :  { %2552 = vst [vmem:[#allocation5 + $0x1b0] sm:$0xff] %v2217_v12 }
 0x2f0   :  { %2553 = vst [vmem:[#allocation5 + $0x1b8] sm:$0xff] %v2219_v46 }
 0x2f6   :  { %v2287_v34 = vpop.f32.mrb[24].mxu0 }
 0x2f7   :  { %v2288_v56 = vadd.f32 %v2287_v34, %v4211_v38  ;;  %v2289_v20 = vpop.f32.mrb[25].mxu0 }
 0x2f8   :  { %v2364_v54 = vpop.f32.mrb[24].mxu1  ;;  %v2290_v35 = vadd.f32 %v2289_v20, %v4211_v38 }
 0x2f9   :  { %v2365_v55 = vadd.f32 %v2364_v54, %v4211_v38  ;;  %v2366_v15 = vpop.f32.mrb[25].mxu1  ;;  %2538 = vst [vmem:[#allocation5 + $0x140] sm:$0xff] %v2288_v56 }
 0x2fa   :  { %v2367_v61 = vadd.f32 %v2366_v15, %v4211_v38  ;;  %2539 = vst [vmem:[#allocation5 + $0x148] sm:$0xff] %v2290_v35 }
 0x2fb   :  { %2540 = vst [vmem:[#allocation5 + $0x150] sm:$0xff] %v2365_v55  ;;  %v2293_v36 = vpop.f32.mrb[26].mxu0 }
 0x2fc   :  { %2541 = vst [vmem:[#allocation5 + $0x158] sm:$0xff] %v2367_v61  ;;  %v2294_v13 = vadd.f32 %v2293_v36, %v4217_v63  ;;  %v2295_v30 = vpop.f32.mrb[27].mxu0  ;;  %v2370_v40 = vpop.f32.mrb[26].mxu1 }
 0x2fd   :  { %v2296_v5 = vadd.f32 %v2295_v30, %v4217_v63  ;;  %v2371_v10 = vadd.f32 %v2370_v40, %v4217_v63  ;;  %v2372_v17 = vpop.f32.mrb[27].mxu1 }
 0x2fe   :  { %2554 = vst [vmem:[#allocation5 + $0x1c0] sm:$0xff] %v2294_v13  ;;  %v2373_v52 = vadd.f32 %v2372_v17, %v4217_v63 }
 0x2ff   :  { %2555 = vst [vmem:[#allocation5 + $0x1c8] sm:$0xff] %v2296_v5  ;;  %2556 = vst [vmem:[#allocation5 + $0x1d0] sm:$0xff] %v2371_v10 }
 0x300   :  { %2557 = vst [vmem:[#allocation5 + $0x1d8] sm:$0xff] %v2373_v52 }
 0x307   :  { %v2441_v14 = vpop.f32.mrb[28].mxu0 }
 0x308   :  { %v2442_v48 = vadd.f32 %v2441_v14, %v4211_v38  ;;  %v2443_v16 = vpop.f32.mrb[29].mxu0 }
 0x309   :  { %v2518_v59 = vpop.f32.mrb[28].mxu1  ;;  %v2444_v37 = vadd.f32 %v2443_v16, %v4211_v38 }
 0x30a   :  { %2542 = vst [vmem:[#allocation5 + $0x160] sm:$0xff] %v2442_v48  ;;  %v2519_v19 = vadd.f32 %v2518_v59, %v4211_v38  ;;  %v2520_v8 = vpop.f32.mrb[29].mxu1 }
 0x30b   :  { %2543 = vst [vmem:[#allocation5 + $0x168] sm:$0xff] %v2444_v37  ;;  %v2521_v21 = vadd.f32 %v2520_v8, %v4211_v38  ;;  %v2447_v42 = vpop.f32.mrb[30].mxu0 }
 0x30c   :  { %2544 = vst [vmem:[#allocation5 + $0x170] sm:$0xff] %v2519_v19  ;;  %v2448_v51 = vadd.f32 %v2447_v42, %v4217_v63  ;;  %v2449_v24 = vpop.f32.mrb[31].mxu0 }
 0x30d   :  { %2545 = vst [vmem:[#allocation5 + $0x178] sm:$0xff] %v2521_v21  ;;  %v2524_v29 = vpop.f32.mrb[30].mxu1  ;;  %v2450_v6 = vadd.f32 %v2449_v24, %v4217_v63 }
 0x30e   :  { %2558 = vst [vmem:[#allocation5 + $0x1e0] sm:$0xff] %v2448_v51  ;;  %v2525_v41 = vadd.f32 %v2524_v29, %v4217_v63  ;;  %v2526_v53 = vpop.f32.mrb[31].mxu1 }
 0x30f   :  { %2559 = vst [vmem:[#allocation5 + $0x1e8] sm:$0xff] %v2450_v6  ;;  %v2527_v25 = vadd.f32 %v2526_v53, %v4217_v63 }
 0x310   :  { %2560 = vst [vmem:[#allocation5 + $0x1f0] sm:$0xff] %v2525_v41 }
 0x311   :  { %2561 = vst [vmem:[#allocation5 + $0x1f8] sm:$0xff] %v2527_v25 }
 0x312   :  { %2828 = shalt.err (!%p2825_p12)
}
 0x313   :  { %s2829_s11 = scalar_lea.hbm %s4299_s5, 8192 }
 0x314   :  { %p2830_p13 = scmp.ne.s32.totalorder %s4299_s5, %s2829_s11  ;;  %p2833_p0 = scmp.lt.u32.totalorder %s2829_s11, %s4299_s5 }
 0x316   :  { %p2835_p1 = pnand %p2833_p0, %p2830_p13 }
 0x318   :  { %2838 = shalt.err (!%p2835_p1)
}
 0x319   :  { %2573 = dma.vmem_to_hbm [thread:$0]  %s2568_s7, 8192, %s4299_s5, [#allocation4], %s2844_s28, %s2844_s28, %s2845_s29  }
 0x31a   :  { %2841 = dma.done.wait [#allocation4], 8192  }
 0x31b   :  { %2842 = vsyncadd [#allocation4], 4294959104 }
 0x31c   :  { %2577 = vsyncpa [#allocation3], 1 }
 0x31d   :  { %2578 = vsyncpa [#allocation4], 1 }

</bundles_post_ra>
